<compile_context>
chip_gen: v7x
topology: tpu7x:2x2x1
jax: 0.10.0
libtpu: 0.0.40
codegen_flags: <defaults>
</compile_context>

<pallas_src>
import functools

import jax
import jax.numpy as jnp
import numpy as np
from jax.experimental import pallas as pl
from jax.experimental.pallas import tpu as pltpu


def _round_up(v, m):
    return (v + m - 1) // m * m


def _bottleneck_kernel(B, H, W, Cpack, Wp, Cp,
                       xh_ref, w1_ref, w2_ref, w3_ref,
                       s1_ref, b1_ref, s2_ref, b2_ref, s3_ref, b3_ref,
                       out_ref, y_ref, pad_ref, col_ref):
    """One grid step = B images. Wp / Cp are 128-multiples (lane-dense)."""
    M = B * H * W

    xh = xh_ref[...].reshape(M, Cpack)                       # f32 packed [x_pad | h]

    # ---- conv1 (1x1 over concat(x, h)) + folded BN1 + ReLU : one bf16 matmul ----
    t1 = jnp.dot(xh.astype(jnp.bfloat16), w1_ref[...],
                 preferred_element_type=jnp.float32)
    t1 = jnp.maximum(t1 * s1_ref[...] + b1_ref[...], 0.0)    # (M, Wp)

    # ---- conv2 (3x3, stride 1, pad 1) via im2col + ONE bf16 matmul ----
    # Zero only the 1-pixel halo; the interior is fully overwritten every step.
    zrow = jnp.zeros((B, 1, W + 2, Wp), jnp.float32)
    zcol = jnp.zeros((B, H, 1, Wp), jnp.float32)
    pad_ref[:, 0:1, :, :] = zrow
    pad_ref[:, H + 1:H + 2, :, :] = zrow
    pad_ref[:, 1:H + 1, 0:1, :] = zcol
    pad_ref[:, 1:H + 1, W + 1:W + 2, :] = zcol
    pad_ref[:, 1:H + 1, 1:W + 1, :] = t1.reshape(B, H, W, Wp)

    for k in range(9):                                       # build im2col buffer once
        dy, dx = divmod(k, 3)
        patch = pad_ref[:, dy:dy + H, dx:dx + W, :].reshape(M, Wp)
        col_ref[:, k * Wp:(k + 1) * Wp] = patch.astype(jnp.bfloat16)

    t2 = jnp.dot(col_ref[...], w2_ref[...],                  # (M, 9*Wp) @ (9*Wp, Wp)
                 preferred_element_type=jnp.float32)
    t2 = jnp.maximum(t2 * s2_ref[...] + b2_ref[...], 0.0)

    # ---- conv3 (1x1) + folded BN3 ----
    y = jnp.dot(t2.astype(jnp.bfloat16), w3_ref[...],
                preferred_element_type=jnp.float32)
    y = y * s3_ref[...] + b3_ref[...]                        # (M, Cp)

    y_ref[...] = y.reshape(B, H, W, Cp)
    # Residual: identity = first Cp channels of the packed input (x, zero-padded),
    # kept in f32 so the skip path stays exact.
    out = jnp.maximum(y + xh[:, :Cp], 0.0)
    out_ref[...] = out.reshape(B, H, W, Cp)


def _pick_b_tile(N, H, W, Cpack, Wp, Cp, budget_bytes=40 * 1024 * 1024):
    per_img = (H * W * Cpack * 4 * 2            # input block (f32), double-buffered
               + 2 * H * W * Cp * 4 * 2         # two output blocks (f32), double-buffered
               + (H + 2) * (W + 2) * Wp * 4     # padded scratch (f32)
               + H * W * 9 * Wp * 2)            # im2col scratch (bf16)
    cap = max(1, budget_bytes // per_img)
    cap = min(cap, max(1, N // 2))              # keep >=2 grid steps for megacore (v7x)
    b = 1
    for d in range(1, N + 1):
        if N % d == 0 and d <= cap:
            b = d
    return b


def rla_v4_bottleneck_nhwc(x, h, kparams, b_tile=None):
    """x: (N,H,W,Cin) f32, h: (N,H,W,Crla) f32. Returns (out, y, h, identity) in NHWC."""
    inplanes, rla, width, cout, Wp, Cp, Cpack = kparams["dims"]
    N, H, W, Cin = x.shape
    assert Cin == inplanes and h.shape[-1] == rla
    assert inplanes == cout, "no-downsample config requires inplanes == planes*4"

    # Pack once in the wrapper: [x | zero-pad to Cp | h] -> single conv1 matmul input,
    # and the first Cp channels double as the (padded) residual identity.
    xh = jnp.concatenate(
        [x, jnp.zeros((N, H, W, Cp - inplanes), x.dtype), h], axis=-1)   # (N,H,W,Cpack)

    if b_tile is None:
        b_tile = _pick_b_tile(N, H, W, Cpack, Wp, Cp)
    assert N % b_tile == 0
    grid = (N // b_tile,)

    kern = functools.partial(_bottleneck_kernel, b_tile, H, W, Cpack, Wp, Cp)

    def full_spec(a):
        return pl.BlockSpec(a.shape, lambda i, _n=a.ndim: (0,) * _n)

    act_spec = pl.BlockSpec((b_tile, H, W, Cpack), lambda i: (i, 0, 0, 0))
    out_spec = pl.BlockSpec((b_tile, H, W, Cp), lambda i: (i, 0, 0, 0))

    # TODO(synk): for large stages (e.g. 56x56, width>=128) add row tiling with a
    # 1-row halo and single-buffered weight specs to stay inside v7x's 64 MiB VMEM.
    out_p, y_p = pl.pallas_call(
        kern,
        out_shape=(jax.ShapeDtypeStruct((N, H, W, Cp), jnp.float32),
                   jax.ShapeDtypeStruct((N, H, W, Cp), jnp.float32)),
        grid=grid,
        in_specs=[act_spec,
                  full_spec(kparams["w1"]), full_spec(kparams["w2"]),
                  full_spec(kparams["w3"]),
                  full_spec(kparams["s1"]), full_spec(kparams["b1"]),
                  full_spec(kparams["s2"]), full_spec(kparams["b2"]),
                  full_spec(kparams["s3"]), full_spec(kparams["b3"])],
        out_specs=(out_spec, out_spec),
        scratch_shapes=[pltpu.VMEM((b_tile, H + 2, W + 2, Wp), jnp.float32),
                        pltpu.VMEM((b_tile * H * W, 9 * Wp), jnp.bfloat16)],
        compiler_params=pltpu.CompilerParams(
            dimension_semantics=("parallel",),
            vmem_limit_bytes=64 * 1024 * 1024),
    )(xh, kparams["w1"], kparams["w2"], kparams["w3"],
      kparams["s1"], kparams["b1"], kparams["s2"], kparams["b2"],
      kparams["s3"], kparams["b3"])

    out = out_p[..., :cout]
    y = y_p[..., :cout]
    return out, y, h, x


def rla_v4_bottleneck(x_nchw, h_nchw, kparams, b_tile=None):
    """NCHW adapter (torch parity). Prefer the NHWC entry point end-to-end to avoid
    round-tripping the full tensors through HBM for layout changes."""
    x = jnp.transpose(x_nchw, (0, 2, 3, 1))
    h = jnp.transpose(h_nchw, (0, 2, 3, 1))
    out, y, _, _ = rla_v4_bottleneck_nhwc(x, h, kparams, b_tile)
    return (jnp.transpose(out, (0, 3, 1, 2)),
            jnp.transpose(y, (0, 3, 1, 2)),
            h_nchw, x_nchw)                                   # (out, y, h, identity)


# ----------------------- parameter construction (synthetic) -----------------------
def init_params(key, inplanes, planes, rla_channel, base_width=64, groups=1):
    width = int(planes * (base_width / 64.0)) * groups
    cout = planes * 4
    cin_tot = inplanes + rla_channel
    ks = jax.random.split(key, 6)
    # PyTorch conv weight layout: (O, I, kH, kW)
    w1 = 0.1 * jax.random.normal(ks[0], (width, cin_tot, 1, 1), jnp.float32)
    w2 = 0.1 * jax.random.normal(ks[1], (width, width, 3, 3), jnp.float32)
    w3 = 0.1 * jax.random.normal(ks[2], (cout, width, 1, 1), jnp.float32)

    def bn(k, c):
        k1, k2, k3, k4 = jax.random.split(k, 4)
        gamma = 1.0 + 0.1 * jax.random.normal(k1, (c,), jnp.float32)
        beta = 0.1 * jax.random.normal(k2, (c,), jnp.float32)
        mean = 0.1 * jax.random.normal(k3, (c,), jnp.float32)
        var = jnp.abs(jax.random.normal(k4, (c,), jnp.float32)) + 0.5
        scale = gamma / jnp.sqrt(var + 1e-5)       # BatchNorm2d eval mode, folded
        shift = beta - mean * scale
        return scale, shift

    s1, b1 = bn(ks[3], width)
    s2, b2 = bn(ks[4], width)
    s3, b3 = bn(ks[5], cout)
    return (w1, w2, w3, s1, b1, s2, b2, s3, b3)


def prepare_kernel_params(raw, inplanes, rla_channel):
    """Pack torch-layout weights into lane-dense (128-padded), bf16, matmul-ready operands."""
    w1, w2, w3, s1, b1, s2, b2, s3, b3 = raw
    width = w1.shape[0]
    cout = w3.shape[0]
    Wp = _round_up(width, 128)
    Cp = _round_up(cout, 128)
    Cpack = Cp + rla_channel                      # [x zero-padded to Cp | h]

    # conv1: (width, inplanes+rla, 1, 1) -> (Cpack, Wp); zero rows for padded channels.
    w1m = jnp.zeros((Cpack, Wp), jnp.float32)
    w1m = w1m.at[:inplanes, :width].set(jnp.transpose(w1[:, :inplanes, 0, 0]))
    w1m = w1m.at[Cp:Cp + rla_channel, :width].set(jnp.transpose(w1[:, inplanes:, 0, 0]))

    # conv2: (width, width, 3, 3) -> (9*Wp, Wp), row order (dy, dx, in_channel).
    w2m = jnp.zeros((3, 3, Wp, Wp), jnp.float32)
    w2m = w2m.at[:, :, :width, :width].set(jnp.transpose(w2, (2, 3, 1, 0)))
    w2m = w2m.reshape(9 * Wp, Wp)

    # conv3: (cout, width, 1, 1) -> (Wp, Cp)
    w3m = jnp.zeros((Wp, Cp), jnp.float32)
    w3m = w3m.at[:width, :cout].set(jnp.transpose(w3[:, :, 0, 0]))

    def padvec(v, n):
        return jnp.zeros((1, n), jnp.float32).at[0, :v.shape[0]].set(v)

    return dict(
        w1=w1m.astype(jnp.bfloat16),
        w2=w2m.astype(jnp.bfloat16),
        w3=w3m.astype(jnp.bfloat16),
        s1=padvec(s1, Wp), b1=padvec(b1, Wp),
        s2=padvec(s2, Wp), b2=padvec(b2, Wp),
        s3=padvec(s3, Cp), b3=padvec(b3, Cp),
        dims=(inplanes, rla_channel, width, cout, Wp, Cp, Cpack),
    )


# ----------------------------- pure-JAX reference ---------------------------------
def ref_forward(x, h, raw):
    w1, w2, w3, s1, b1, s2, b2, s3, b3 = raw

    def conv(inp, w, pad):
        return jax.lax.conv_general_dilated(
            inp, w, (1, 1), pad, dimension_numbers=('NCHW', 'OIHW', 'NCHW'),
            precision=jax.lax.Precision.HIGHEST)

    def bn(t, s, b):
        return t * s[None, :, None, None] + b[None, :, None, None]

    xc = jnp.concatenate([x, h], axis=1)
    t = jax.nn.relu(bn(conv(xc, w1, 'VALID'), s1, b1))
    t = jax.nn.relu(bn(conv(t, w2, ((1, 1), (1, 1))), s2, b2))
    y = bn(conv(t, w3, 'VALID'), s3, b3)
    out = jax.nn.relu(y + x)
    return out, y, h, x


if __name__ == "__main__":
    # Small config consistent with the module: inplanes must equal planes*4
    # for the residual add (no downsample branch).
    N, planes, rla_channel, H, W = 2, 4, 8, 8, 8
    inplanes = planes * 4                                    # 16

    key = jax.random.PRNGKey(0)
    kx, kh, kp = jax.random.split(key, 3)
    x = jax.random.normal(kx, (N, inplanes, H, W), jnp.float32)
    h = jax.random.normal(kh, (N, rla_channel, H, W), jnp.float32)

    raw = init_params(kp, inplanes, planes, rla_channel)
    kparams = prepare_kernel_params(raw, inplanes, rla_channel)

    fwd = jax.jit(lambda xx, hh: rla_v4_bottleneck(xx, hh, kparams))
    out, y, h_out, identity = jax.block_until_ready(fwd(x, h))

    out_r, y_r, h_r, id_r = ref_forward(x, h, raw)
    np.testing.assert_allclose(np.asarray(out), np.asarray(out_r), rtol=2e-2, atol=2e-2)
    np.testing.assert_allclose(np.asarray(y), np.asarray(y_r), rtol=2e-2, atol=2e-2)
    np.testing.assert_allclose(np.asarray(h_out), np.asarray(h_r), rtol=0, atol=0)
    np.testing.assert_allclose(np.asarray(identity), np.asarray(id_r), rtol=0, atol=0)

    print("KERNEL_OK")
</pallas_src>

<mosaic_0001>
module attributes {stable_mosaic.version = 11 : i64} {
  func.func @_bottleneck_kernel(%arg0: i32, %arg1: memref<1x8x8x136xf32, #tpu.memory_space<vmem>>, %arg2: memref<136x128xbf16, #tpu.memory_space<vmem>>, %arg3: memref<1152x128xbf16, #tpu.memory_space<vmem>>, %arg4: memref<128x128xbf16, #tpu.memory_space<vmem>>, %arg5: memref<1x128xf32, #tpu.memory_space<vmem>>, %arg6: memref<1x128xf32, #tpu.memory_space<vmem>>, %arg7: memref<1x128xf32, #tpu.memory_space<vmem>>, %arg8: memref<1x128xf32, #tpu.memory_space<vmem>>, %arg9: memref<1x128xf32, #tpu.memory_space<vmem>>, %arg10: memref<1x128xf32, #tpu.memory_space<vmem>>, %arg11: memref<1x8x8x128xf32, #tpu.memory_space<vmem>>, %arg12: memref<1x8x8x128xf32, #tpu.memory_space<vmem>>, %arg13: memref<1x10x10x128xf32, #tpu.memory_space<vmem>>, %arg14: memref<64x1152xbf16, #tpu.memory_space<vmem>>) attributes {dimension_semantics = [#tpu.dimension_semantics<parallel>], iteration_bounds = array<i64: 2>, scalar_prefetch = 0 : i64, scratch_operands = 2 : i64, tpu.core_type = #tpu.core_type<tc>, window_params = [{transform_indices = @transform_0, window_bounds = array<i64: 1, 8, 8, 136>}, {pipeline_mode = #tpu.pipeline_mode<synchronous>, transform_indices = @transform_1, window_bounds = array<i64: 136, 128>}, {pipeline_mode = #tpu.pipeline_mode<synchronous>, transform_indices = @transform_2, window_bounds = array<i64: 1152, 128>}, {pipeline_mode = #tpu.pipeline_mode<synchronous>, transform_indices = @transform_3, window_bounds = array<i64: 128, 128>}, {pipeline_mode = #tpu.pipeline_mode<synchronous>, transform_indices = @transform_4, window_bounds = array<i64: 1, 128>}, {pipeline_mode = #tpu.pipeline_mode<synchronous>, transform_indices = @transform_5, window_bounds = array<i64: 1, 128>}, {pipeline_mode = #tpu.pipeline_mode<synchronous>, transform_indices = @transform_6, window_bounds = array<i64: 1, 128>}, {pipeline_mode = #tpu.pipeline_mode<synchronous>, transform_indices = @transform_7, window_bounds = array<i64: 1, 128>}, {pipeline_mode = #tpu.pipeline_mode<synchronous>, transform_indices = @transform_8, window_bounds = array<i64: 1, 128>}, {pipeline_mode = #tpu.pipeline_mode<synchronous>, transform_indices = @transform_9, window_bounds = array<i64: 1, 128>}, {transform_indices = @transform_10, window_bounds = array<i64: 1, 8, 8, 128>}, {transform_indices = @transform_11, window_bounds = array<i64: 1, 8, 8, 128>}]} {
    %c0 = arith.constant 0 : index
    %c0_0 = arith.constant 0 : index
    %c0_1 = arith.constant 0 : index
    %c0_2 = arith.constant 0 : index
    %0 = vector.load %arg1[%c0, %c0_0, %c0_1, %c0_2] : memref<1x8x8x136xf32, #tpu.memory_space<vmem>>, vector<1x8x8x136xf32>
    %1 = vector.shape_cast %0 : vector<1x8x8x136xf32> to vector<64x136xf32>
    %2 = arith.truncf %1 : vector<64x136xf32> to vector<64x136xbf16>
    %c0_3 = arith.constant 0 : index
    %c0_4 = arith.constant 0 : index
    %3 = vector.load %arg2[%c0_3, %c0_4] : memref<136x128xbf16, #tpu.memory_space<vmem>>, vector<136x128xbf16>
    %cst = arith.constant dense<0.000000e+00> : vector<64x128xf32>
    %4 = tpu.matmul %2, %3, %cst {dimension_numbers = #tpu.dot_dimension_numbers<[1], [0], [0], [1], [0, 0, 1, 1], [], []>} : vector<64x136xbf16>, vector<136x128xbf16>, vector<64x128xf32> -> vector<64x128xf32>
    %c0_5 = arith.constant 0 : index
    %c0_6 = arith.constant 0 : index
    %5 = vector.load %arg5[%c0_5, %c0_6] : memref<1x128xf32, #tpu.memory_space<vmem>>, vector<1x128xf32>
    %6 = vector.broadcast %5 : vector<1x128xf32> to vector<64x128xf32>
    %7 = arith.mulf %4, %6 : vector<64x128xf32>
    %c0_7 = arith.constant 0 : index
    %c0_8 = arith.constant 0 : index
    %8 = vector.load %arg6[%c0_7, %c0_8] : memref<1x128xf32, #tpu.memory_space<vmem>>, vector<1x128xf32>
    %9 = vector.broadcast %8 : vector<1x128xf32> to vector<64x128xf32>
    %10 = arith.addf %7, %9 : vector<64x128xf32>
    %cst_9 = arith.constant 0.000000e+00 : f32
    %11 = vector.broadcast %cst_9 : f32 to vector<64x128xf32>
    %12 = arith.maximumf %10, %11 : vector<64x128xf32>
    %cst_10 = arith.constant 0.000000e+00 : f32
    %13 = vector.broadcast %cst_10 : f32 to vector<1x1x10x128xf32>
    %cst_11 = arith.constant 0.000000e+00 : f32
    %14 = vector.broadcast %cst_11 : f32 to vector<1x8x1x128xf32>
    %c0_12 = arith.constant 0 : index
    %c0_13 = arith.constant 0 : index
    %c0_14 = arith.constant 0 : index
    %c0_15 = arith.constant 0 : index
    %15 = vector.load %arg13[%c0_12, %c0_13, %c0_14, %c0_15] : memref<1x10x10x128xf32, #tpu.memory_space<vmem>>, vector<1x1x10x128xf32>
    tpu.vector_store %arg13[%c0_12, %c0_13, %c0_14, %c0_15], %13 {strides = array<i32>} : memref<1x10x10x128xf32, #tpu.memory_space<vmem>>, vector<1x1x10x128xf32>,
    %c0_16 = arith.constant 0 : index
    %c9 = arith.constant 9 : index
    %c0_17 = arith.constant 0 : index
    %c0_18 = arith.constant 0 : index
    %16 = vector.load %arg13[%c0_16, %c9, %c0_17, %c0_18] : memref<1x10x10x128xf32, #tpu.memory_space<vmem>>, vector<1x1x10x128xf32>
    tpu.vector_store %arg13[%c0_16, %c9, %c0_17, %c0_18], %13 {strides = array<i32>} : memref<1x10x10x128xf32, #tpu.memory_space<vmem>>, vector<1x1x10x128xf32>,
    %c0_19 = arith.constant 0 : index
    %c1 = arith.constant 1 : index
    %c0_20 = arith.constant 0 : index
    %c0_21 = arith.constant 0 : index
    %17 = vector.load %arg13[%c0_19, %c1, %c0_20, %c0_21] : memref<1x10x10x128xf32, #tpu.memory_space<vmem>>, vector<1x8x1x128xf32>
    tpu.vector_store %arg13[%c0_19, %c1, %c0_20, %c0_21], %14 {strides = array<i32>} : memref<1x10x10x128xf32, #tpu.memory_space<vmem>>, vector<1x8x1x128xf32>,
    %c0_22 = arith.constant 0 : index
    %c1_23 = arith.constant 1 : index
    %c9_24 = arith.constant 9 : index
    %c0_25 = arith.constant 0 : index
    %18 = vector.load %arg13[%c0_22, %c1_23, %c9_24, %c0_25] : memref<1x10x10x128xf32, #tpu.memory_space<vmem>>, vector<1x8x1x128xf32>
    tpu.vector_store %arg13[%c0_22, %c1_23, %c9_24, %c0_25], %14 {strides = array<i32>} : memref<1x10x10x128xf32, #tpu.memory_space<vmem>>, vector<1x8x1x128xf32>,
    %19 = vector.shape_cast %12 : vector<64x128xf32> to vector<1x8x8x128xf32>
    %c0_26 = arith.constant 0 : index
    %c1_27 = arith.constant 1 : index
    %c1_28 = arith.constant 1 : index
    %c0_29 = arith.constant 0 : index
    %20 = vector.load %arg13[%c0_26, %c1_27, %c1_28, %c0_29] : memref<1x10x10x128xf32, #tpu.memory_space<vmem>>, vector<1x8x8x128xf32>
    tpu.vector_store %arg13[%c0_26, %c1_27, %c1_28, %c0_29], %19 {strides = array<i32>} : memref<1x10x10x128xf32, #tpu.memory_space<vmem>>, vector<1x8x8x128xf32>,
    %c0_30 = arith.constant 0 : index
    %c0_31 = arith.constant 0 : index
    %c0_32 = arith.constant 0 : index
    %c0_33 = arith.constant 0 : index
    %21 = vector.load %arg13[%c0_30, %c0_31, %c0_32, %c0_33] : memref<1x10x10x128xf32, #tpu.memory_space<vmem>>, vector<1x8x8x128xf32>
    %22 = vector.shape_cast %21 : vector<1x8x8x128xf32> to vector<64x128xf32>
    %23 = arith.truncf %22 : vector<64x128xf32> to vector<64x128xbf16>
    %c0_34 = arith.constant 0 : index
    %c0_35 = arith.constant 0 : index
    %24 = vector.load %arg14[%c0_34, %c0_35] : memref<64x1152xbf16, #tpu.memory_space<vmem>>, vector<64x128xbf16>
    tpu.vector_store %arg14[%c0_34, %c0_35], %23 {strides = array<i32>} : memref<64x1152xbf16, #tpu.memory_space<vmem>>, vector<64x128xbf16>,
    %c0_36 = arith.constant 0 : index
    %c0_37 = arith.constant 0 : index
    %c1_38 = arith.constant 1 : index
    %c0_39 = arith.constant 0 : index
    %25 = vector.load %arg13[%c0_36, %c0_37, %c1_38, %c0_39] : memref<1x10x10x128xf32, #tpu.memory_space<vmem>>, vector<1x8x8x128xf32>
    %26 = vector.shape_cast %25 : vector<1x8x8x128xf32> to vector<64x128xf32>
    %27 = arith.truncf %26 : vector<64x128xf32> to vector<64x128xbf16>
    %c0_40 = arith.constant 0 : index
    %c128 = arith.constant 128 : index
    %28 = vector.load %arg14[%c0_40, %c128] : memref<64x1152xbf16, #tpu.memory_space<vmem>>, vector<64x128xbf16>
    tpu.vector_store %arg14[%c0_40, %c128], %27 {strides = array<i32>} : memref<64x1152xbf16, #tpu.memory_space<vmem>>, vector<64x128xbf16>,
    %c0_41 = arith.constant 0 : index
    %c0_42 = arith.constant 0 : index
    %c2 = arith.constant 2 : index
    %c0_43 = arith.constant 0 : index
    %29 = vector.load %arg13[%c0_41, %c0_42, %c2, %c0_43] : memref<1x10x10x128xf32, #tpu.memory_space<vmem>>, vector<1x8x8x128xf32>
    %30 = vector.shape_cast %29 : vector<1x8x8x128xf32> to vector<64x128xf32>
    %31 = arith.truncf %30 : vector<64x128xf32> to vector<64x128xbf16>
    %c0_44 = arith.constant 0 : index
    %c256 = arith.constant 256 : index
    %32 = vector.load %arg14[%c0_44, %c256] : memref<64x1152xbf16, #tpu.memory_space<vmem>>, vector<64x128xbf16>
    tpu.vector_store %arg14[%c0_44, %c256], %31 {strides = array<i32>} : memref<64x1152xbf16, #tpu.memory_space<vmem>>, vector<64x128xbf16>,
    %c0_45 = arith.constant 0 : index
    %c1_46 = arith.constant 1 : index
    %c0_47 = arith.constant 0 : index
    %c0_48 = arith.constant 0 : index
    %33 = vector.load %arg13[%c0_45, %c1_46, %c0_47, %c0_48] : memref<1x10x10x128xf32, #tpu.memory_space<vmem>>, vector<1x8x8x128xf32>
    %34 = vector.shape_cast %33 : vector<1x8x8x128xf32> to vector<64x128xf32>
    %35 = arith.truncf %34 : vector<64x128xf32> to vector<64x128xbf16>
    %c0_49 = arith.constant 0 : index
    %c384 = arith.constant 384 : index
    %36 = vector.load %arg14[%c0_49, %c384] : memref<64x1152xbf16, #tpu.memory_space<vmem>>, vector<64x128xbf16>
    tpu.vector_store %arg14[%c0_49, %c384], %35 {strides = array<i32>} : memref<64x1152xbf16, #tpu.memory_space<vmem>>, vector<64x128xbf16>,
    %c0_50 = arith.constant 0 : index
    %c1_51 = arith.constant 1 : index
    %c1_52 = arith.constant 1 : index
    %c0_53 = arith.constant 0 : index
    %37 = vector.load %arg13[%c0_50, %c1_51, %c1_52, %c0_53] : memref<1x10x10x128xf32, #tpu.memory_space<vmem>>, vector<1x8x8x128xf32>
    %38 = vector.shape_cast %37 : vector<1x8x8x128xf32> to vector<64x128xf32>
    %39 = arith.truncf %38 : vector<64x128xf32> to vector<64x128xbf16>
    %c0_54 = arith.constant 0 : index
    %c512 = arith.constant 512 : index
    %40 = vector.load %arg14[%c0_54, %c512] : memref<64x1152xbf16, #tpu.memory_space<vmem>>, vector<64x128xbf16>
    tpu.vector_store %arg14[%c0_54, %c512], %39 {strides = array<i32>} : memref<64x1152xbf16, #tpu.memory_space<vmem>>, vector<64x128xbf16>,
    %c0_55 = arith.constant 0 : index
    %c1_56 = arith.constant 1 : index
    %c2_57 = arith.constant 2 : index
    %c0_58 = arith.constant 0 : index
    %41 = vector.load %arg13[%c0_55, %c1_56, %c2_57, %c0_58] : memref<1x10x10x128xf32, #tpu.memory_space<vmem>>, vector<1x8x8x128xf32>
    %42 = vector.shape_cast %41 : vector<1x8x8x128xf32> to vector<64x128xf32>
    %43 = arith.truncf %42 : vector<64x128xf32> to vector<64x128xbf16>
    %c0_59 = arith.constant 0 : index
    %c640 = arith.constant 640 : index
    %44 = vector.load %arg14[%c0_59, %c640] : memref<64x1152xbf16, #tpu.memory_space<vmem>>, vector<64x128xbf16>
    tpu.vector_store %arg14[%c0_59, %c640], %43 {strides = array<i32>} : memref<64x1152xbf16, #tpu.memory_space<vmem>>, vector<64x128xbf16>,
    %c0_60 = arith.constant 0 : index
    %c2_61 = arith.constant 2 : index
    %c0_62 = arith.constant 0 : index
    %c0_63 = arith.constant 0 : index
    %45 = vector.load %arg13[%c0_60, %c2_61, %c0_62, %c0_63] : memref<1x10x10x128xf32, #tpu.memory_space<vmem>>, vector<1x8x8x128xf32>
    %46 = vector.shape_cast %45 : vector<1x8x8x128xf32> to vector<64x128xf32>
    %47 = arith.truncf %46 : vector<64x128xf32> to vector<64x128xbf16>
    %c0_64 = arith.constant 0 : index
    %c768 = arith.constant 768 : index
    %48 = vector.load %arg14[%c0_64, %c768] : memref<64x1152xbf16, #tpu.memory_space<vmem>>, vector<64x128xbf16>
    tpu.vector_store %arg14[%c0_64, %c768], %47 {strides = array<i32>} : memref<64x1152xbf16, #tpu.memory_space<vmem>>, vector<64x128xbf16>,
    %c0_65 = arith.constant 0 : index
    %c2_66 = arith.constant 2 : index
    %c1_67 = arith.constant 1 : index
    %c0_68 = arith.constant 0 : index
    %49 = vector.load %arg13[%c0_65, %c2_66, %c1_67, %c0_68] : memref<1x10x10x128xf32, #tpu.memory_space<vmem>>, vector<1x8x8x128xf32>
    %50 = vector.shape_cast %49 : vector<1x8x8x128xf32> to vector<64x128xf32>
    %51 = arith.truncf %50 : vector<64x128xf32> to vector<64x128xbf16>
    %c0_69 = arith.constant 0 : index
    %c896 = arith.constant 896 : index
    %52 = vector.load %arg14[%c0_69, %c896] : memref<64x1152xbf16, #tpu.memory_space<vmem>>, vector<64x128xbf16>
    tpu.vector_store %arg14[%c0_69, %c896], %51 {strides = array<i32>} : memref<64x1152xbf16, #tpu.memory_space<vmem>>, vector<64x128xbf16>,
    %c0_70 = arith.constant 0 : index
    %c2_71 = arith.constant 2 : index
    %c2_72 = arith.constant 2 : index
    %c0_73 = arith.constant 0 : index
    %53 = vector.load %arg13[%c0_70, %c2_71, %c2_72, %c0_73] : memref<1x10x10x128xf32, #tpu.memory_space<vmem>>, vector<1x8x8x128xf32>
    %54 = vector.shape_cast %53 : vector<1x8x8x128xf32> to vector<64x128xf32>
    %55 = arith.truncf %54 : vector<64x128xf32> to vector<64x128xbf16>
    %c0_74 = arith.constant 0 : index
    %c1024 = arith.constant 1024 : index
    %56 = vector.load %arg14[%c0_74, %c1024] : memref<64x1152xbf16, #tpu.memory_space<vmem>>, vector<64x128xbf16>
    tpu.vector_store %arg14[%c0_74, %c1024], %55 {strides = array<i32>} : memref<64x1152xbf16, #tpu.memory_space<vmem>>, vector<64x128xbf16>,
    %c0_75 = arith.constant 0 : index
    %c0_76 = arith.constant 0 : index
    %57 = vector.load %arg14[%c0_75, %c0_76] : memref<64x1152xbf16, #tpu.memory_space<vmem>>, vector<64x1152xbf16>
    %c0_77 = arith.constant 0 : index
    %c0_78 = arith.constant 0 : index
    %58 = vector.load %arg3[%c0_77, %c0_78] : memref<1152x128xbf16, #tpu.memory_space<vmem>>, vector<1152x128xbf16>
    %cst_79 = arith.constant dense<0.000000e+00> : vector<64x128xf32>
    %59 = tpu.matmul %57, %58, %cst_79 {dimension_numbers = #tpu.dot_dimension_numbers<[1], [0], [0], [1], [0, 0, 1, 1], [], []>} : vector<64x1152xbf16>, vector<1152x128xbf16>, vector<64x128xf32> -> vector<64x128xf32>
    %c0_80 = arith.constant 0 : index
    %c0_81 = arith.constant 0 : index
    %60 = vector.load %arg7[%c0_80, %c0_81] : memref<1x128xf32, #tpu.memory_space<vmem>>, vector<1x128xf32>
    %61 = vector.broadcast %60 : vector<1x128xf32> to vector<64x128xf32>
    %62 = arith.mulf %59, %61 : vector<64x128xf32>
    %c0_82 = arith.constant 0 : index
    %c0_83 = arith.constant 0 : index
    %63 = vector.load %arg8[%c0_82, %c0_83] : memref<1x128xf32, #tpu.memory_space<vmem>>, vector<1x128xf32>
    %64 = vector.broadcast %63 : vector<1x128xf32> to vector<64x128xf32>
    %65 = arith.addf %62, %64 : vector<64x128xf32>
    %cst_84 = arith.constant 0.000000e+00 : f32
    %66 = vector.broadcast %cst_84 : f32 to vector<64x128xf32>
    %67 = arith.maximumf %65, %66 : vector<64x128xf32>
    %68 = arith.truncf %67 : vector<64x128xf32> to vector<64x128xbf16>
    %c0_85 = arith.constant 0 : index
    %c0_86 = arith.constant 0 : index
    %69 = vector.load %arg4[%c0_85, %c0_86] : memref<128x128xbf16, #tpu.memory_space<vmem>>, vector<128x128xbf16>
    %cst_87 = arith.constant dense<0.000000e+00> : vector<64x128xf32>
    %70 = tpu.matmul %68, %69, %cst_87 {dimension_numbers = #tpu.dot_dimension_numbers<[1], [0], [0], [1], [0, 0, 1, 1], [], []>} : vector<64x128xbf16>, vector<128x128xbf16>, vector<64x128xf32> -> vector<64x128xf32>
    %c0_88 = arith.constant 0 : index
    %c0_89 = arith.constant 0 : index
    %71 = vector.load %arg9[%c0_88, %c0_89] : memref<1x128xf32, #tpu.memory_space<vmem>>, vector<1x128xf32>
    %72 = vector.broadcast %71 : vector<1x128xf32> to vector<64x128xf32>
    %73 = arith.mulf %70, %72 : vector<64x128xf32>
    %c0_90 = arith.constant 0 : index
    %c0_91 = arith.constant 0 : index
    %74 = vector.load %arg10[%c0_90, %c0_91] : memref<1x128xf32, #tpu.memory_space<vmem>>, vector<1x128xf32>
    %75 = vector.broadcast %74 : vector<1x128xf32> to vector<64x128xf32>
    %76 = arith.addf %73, %75 : vector<64x128xf32>
    %77 = vector.shape_cast %76 : vector<64x128xf32> to vector<1x8x8x128xf32>
    %c0_92 = arith.constant 0 : index
    %c0_93 = arith.constant 0 : index
    %c0_94 = arith.constant 0 : index
    %c0_95 = arith.constant 0 : index
    %78 = vector.load %arg12[%c0_92, %c0_93, %c0_94, %c0_95] : memref<1x8x8x128xf32, #tpu.memory_space<vmem>>, vector<1x8x8x128xf32>
    tpu.vector_store %arg12[%c0_92, %c0_93, %c0_94, %c0_95], %77 {strides = array<i32>} : memref<1x8x8x128xf32, #tpu.memory_space<vmem>>, vector<1x8x8x128xf32>,
    %79 = vector.extract_strided_slice %1 {offsets = [0, 0], sizes = [64, 128], strides = [1, 1]} : vector<64x136xf32> to vector<64x128xf32>
    %80 = arith.addf %76, %79 : vector<64x128xf32>
    %cst_96 = arith.constant 0.000000e+00 : f32
    %81 = vector.broadcast %cst_96 : f32 to vector<64x128xf32>
    %82 = arith.maximumf %80, %81 : vector<64x128xf32>
    %83 = vector.shape_cast %82 : vector<64x128xf32> to vector<1x8x8x128xf32>
    %c0_97 = arith.constant 0 : index
    %c0_98 = arith.constant 0 : index
    %c0_99 = arith.constant 0 : index
    %c0_100 = arith.constant 0 : index
    %84 = vector.load %arg11[%c0_97, %c0_98, %c0_99, %c0_100] : memref<1x8x8x128xf32, #tpu.memory_space<vmem>>, vector<1x8x8x128xf32>
    tpu.vector_store %arg11[%c0_97, %c0_98, %c0_99, %c0_100], %83 {strides = array<i32>} : memref<1x8x8x128xf32, #tpu.memory_space<vmem>>, vector<1x8x8x128xf32>,
    return
  }
  func.func @transform_0(%arg0: i32) -> (i32, i32, i32, i32) {
    %c0_i32 = arith.constant 0 : i32
    %c0_i32_0 = arith.constant 0 : i32
    %c0_i32_1 = arith.constant 0 : i32
    %c0_i32_2 = arith.constant 0 : i32
    return %arg0, %c0_i32, %c0_i32_0, %c0_i32_1 : i32, i32, i32, i32
  }
  func.func @transform_1(%arg0: i32) -> (i32, i32) {
    %c0_i32 = arith.constant 0 : i32
    %c0_i32_0 = arith.constant 0 : i32
    %c0_i32_1 = arith.constant 0 : i32
    return %c0_i32, %c0_i32_0 : i32, i32
  }
  func.func @transform_2(%arg0: i32) -> (i32, i32) {
    %c0_i32 = arith.constant 0 : i32
    %c0_i32_0 = arith.constant 0 : i32
    %c0_i32_1 = arith.constant 0 : i32
    return %c0_i32, %c0_i32_0 : i32, i32
  }
  func.func @transform_3(%arg0: i32) -> (i32, i32) {
    %c0_i32 = arith.constant 0 : i32
    %c0_i32_0 = arith.constant 0 : i32
    %c0_i32_1 = arith.constant 0 : i32
    return %c0_i32, %c0_i32_0 : i32, i32
  }
  func.func @transform_4(%arg0: i32) -> (i32, i32) {
    %c0_i32 = arith.constant 0 : i32
    %c0_i32_0 = arith.constant 0 : i32
    %c0_i32_1 = arith.constant 0 : i32
    return %c0_i32, %c0_i32_0 : i32, i32
  }
  func.func @transform_5(%arg0: i32) -> (i32, i32) {
    %c0_i32 = arith.constant 0 : i32
    %c0_i32_0 = arith.constant 0 : i32
    %c0_i32_1 = arith.constant 0 : i32
    return %c0_i32, %c0_i32_0 : i32, i32
  }
  func.func @transform_6(%arg0: i32) -> (i32, i32) {
    %c0_i32 = arith.constant 0 : i32
    %c0_i32_0 = arith.constant 0 : i32
    %c0_i32_1 = arith.constant 0 : i32
    return %c0_i32, %c0_i32_0 : i32, i32
  }
  func.func @transform_7(%arg0: i32) -> (i32, i32) {
    %c0_i32 = arith.constant 0 : i32
    %c0_i32_0 = arith.constant 0 : i32
    %c0_i32_1 = arith.constant 0 : i32
    return %c0_i32, %c0_i32_0 : i32, i32
  }
  func.func @transform_8(%arg0: i32) -> (i32, i32) {
    %c0_i32 = arith.constant 0 : i32
    %c0_i32_0 = arith.constant 0 : i32
    %c0_i32_1 = arith.constant 0 : i32
    return %c0_i32, %c0_i32_0 : i32, i32
  }
  func.func @transform_9(%arg0: i32) -> (i32, i32) {
    %c0_i32 = arith.constant 0 : i32
    %c0_i32_0 = arith.constant 0 : i32
    %c0_i32_1 = arith.constant 0 : i32
    return %c0_i32, %c0_i32_0 : i32, i32
  }
  func.func @transform_10(%arg0: i32) -> (i32, i32, i32, i32) {
    %c0_i32 = arith.constant 0 : i32
    %c0_i32_0 = arith.constant 0 : i32
    %c0_i32_1 = arith.constant 0 : i32
    %c0_i32_2 = arith.constant 0 : i32
    return %arg0, %c0_i32, %c0_i32_0, %c0_i32_1 : i32, i32, i32, i32
  }
  func.func @transform_11(%arg0: i32) -> (i32, i32, i32, i32) {
    %c0_i32 = arith.constant 0 : i32
    %c0_i32_0 = arith.constant 0 : i32
    %c0_i32_1 = arith.constant 0 : i32
    %c0_i32_2 = arith.constant 0 : i32
    return %arg0, %c0_i32, %c0_i32_0, %c0_i32_1 : i32, i32, i32, i32
  }
}

</mosaic_0001>

<bundles_post_ra>
// kernel: _lambda_.1
= control target key start
LH: loop header
LB: loop body
LE: loop exit
PB: predicated region body
PF: predicated region fallthrough
CT: control target
= control target key end

     0   :  { %s4060_s0 = inlined_call_operand.hbm [shape: f32[2,8,8,136], index: 0, kind: input, shape index: {}]   ;;  %s4061_s1 = inlined_call_operand.hbm [shape: bf16[136,128], index: 1, kind: input, shape index: {}]   ;;  %s4062_s2 = inlined_call_operand.hbm [shape: bf16[1152,128], index: 2, kind: input, shape index: {}]   ;;  %s4063_s3 = inlined_call_operand.hbm [shape: bf16[128,128], index: 3, kind: input, shape index: {}]   ;;  %s4064_s4 = inlined_call_operand.hbm [shape: f32[1,128], index: 4, kind: input, shape index: {}]   ;;  %s4065_s5 = inlined_call_operand.hbm [shape: f32[1,128], index: 5, kind: input, shape index: {}]   ;;  %s4066_s6 = inlined_call_operand.hbm [shape: f32[1,128], index: 6, kind: input, shape index: {}]   ;;  %s4067_s7 = inlined_call_operand.hbm [shape: f32[1,128], index: 7, kind: input, shape index: {}]   ;;  %s4068_s8 = inlined_call_operand.hbm [shape: f32[1,128], index: 8, kind: input, shape index: {}]   ;;  %s4069_s9 = inlined_call_operand.hbm [shape: f32[1,128], index: 9, kind: input, shape index: {}]   ;;  %s4070_s10 = inlined_call_operand.hbm [shape: f32[2,8,8,128], index: 10, kind: output, shape index: {0}]   ;;  %s4071_s11 = inlined_call_operand.hbm [shape: f32[2,8,8,128], index: 11, kind: output, shape index: {1}]  }
   0x1   :  { %4080 = sst [smem:[#allocation33_spill]] %s4060_s0 }
   0x2   :  { %4081 = sst [smem:[#allocation34_spill]] %s4061_s1 }
   0x3   :  { %4082 = sst [smem:[#allocation35_spill]] %s4062_s2 }
   0x4   :  { %4083 = sst [smem:[#allocation36_spill]] %s4063_s3 }
   0x5   :  { %4084 = sst [smem:[#allocation37_spill]] %s4070_s10 }
   0x6   :  { %4085 = sst [smem:[#allocation38_spill]] %s4071_s11 }
   0x7   :  { %17 = vsyncpa [#allocation5], 0 }
   0x8   :  { %19 = vsyncpa [#allocation5 + $0x1], 0 }
   0x9   :  { %20 = vsyncpa [#allocation8], 0 }
   0xa   :  { %21 = vsyncpa [#allocation11], 0 }
   0xb   :  { %22 = vsyncpa [#allocation14], 0 }
   0xc   :  { %23 = vsyncpa [#allocation17], 0 }
   0xd   :  { %24 = vsyncpa [#allocation20], 0 }
   0xe   :  { %25 = vsyncpa [#allocation6], 0 }
   0xf   :  { %27 = vsyncpa [#allocation6 + $0x1], 0 }
  0x10   :  { %28 = vsyncpa [#allocation23], 0 }
  0x11   :  { %30 = vsyncpa [#allocation23 + $0x1], 0  ;;  %s3434_s17 = smov 0   ;;  %s3436_s18 = smov 0  }
  0x12   :  { %s3438_s19 = smov 0   ;;  %s3440_s20 = smov 0  }
  0x13 LB: > { %s3354_s21 = smov [#allocation7]   ;;  %s3455_s23 = sadd.s32 4294967295, %s3352_s20   ;;  %s3352_s20 = sphi %s3440_s20, %s4123_s20   ;;  %s3348_s19 = sphi %s3438_s19, %s4122_s19   ;;  %s3344_s18 = sphi %s3436_s18, %s4121_s18   ;;  %s3340_s17 = sphi %s3434_s17, %s4120_s17  }
  0x14   : > { %s320_s22 = sshll.u32 %s3354_s21, 4  ;;  %p2320_p0 = scmp.ge.s32.totalorder %s3352_s20, 1  ;;  %s3460_s22 = int_to_ptr.vmem [resolvable:$true] %s320_s22 }
  0x15   : > { %p4076_p1 = scmp.eq.s32.totalorder %s3455_s23, 0  ;;  %p308_p2 = scmp.lt.s32.totalorder %s3352_s20, 3 }
  0x16   : > { %s3355_s25 = smov [#allocation10]   ;;  %s3356_s28 = smov [#allocation13]  }
  0x17   : > { %p3462_p3 = pnand %p2320_p0, %p308_p2  ;;  %s346_s26 = sshll.u32 %s3355_s25, 4  ;;  %s3475_s26 = int_to_ptr.vmem [resolvable:$true] %s346_s26 }
  0x18   : > { %s371_s29 = sshll.u32 %s3356_s28, 4  ;;  %s4089_s1 = sld [smem:[#allocation34_spill]]  ;;  %s3477_s29 = int_to_ptr.vmem [resolvable:$true] %s371_s29 }
  0x19   : > { %s4086_s24 = scalar_select %p3462_p3, 1, 0 }
  0x1a   : > { %p2747_p5 = pneg %p3462_p3 }
  0x1b   : > { %4087 = sst [smem:[#allocation32_spill]] %s4086_s24 }
  0x1c   : > { %p3471_p6 = pnand %p2747_p5, %p4076_p1 }
  0x1e   : > { %s2952_s13 = scalar_lea.hbm %s4089_s1, 1088  ;;  %p3487_p8 = pneg %p3471_p6 }
  0x1f   : > { %p2953_p7 = scmp.ne.s32.totalorder %s4089_s1, %s2952_s13  ;;  %p2959_p11 = scmp.lt.u32.totalorder %s2952_s13, %s4089_s1 }
  0x21   : > { %p2955_p9 = pnand %p3487_p8, %p2953_p7 }
  0x23   : > { %p2956_p10 = pneg %p2955_p9 }
  0x25   : > { %p2961_p12 = pnand %p2959_p11, %p2956_p10 }
  0x27   : > { %2964 = shalt.err (!%p2961_p12)
}
  0x28   : > { %s2965_s28 = scalar_lea.vmem %s3460_s22, 1088  ;;  %p2973_p5 = scmp.lt.s32.totalorder %s3460_s22, %s3460_s22 }
  0x29   : > { %p2966_p13 = scmp.ne.s32.totalorder %s3460_s22, %s2965_s28  ;;  %p2974_p4 = scmp.lt.s32.totalorder %s2965_s28, %s2965_s28 }
  0x2b   : > { %p2968_p0 = pnand %p2966_p13, %p3487_p8  ;;  %p2975_p7 = por %p2974_p4, %p2973_p5 }
  0x2d   : > { %p2969_p2 = pneg %p2968_p0 }
  0x2f   : > { %p2976_p9 = pnand %p2975_p7, %p2969_p2 }
  0x31   : > { %2979 = shalt.err (!%p2976_p9)
}
  0x32   : > { %s4075_s30 = smov 64   ;;  %s3358_s12 = smov 4  }
  0x33   : > { %2750 = dma.hbm_to_vmem [thread:$0]  (!%p3471_p6), %s4089_s1, 1088, %s3460_s22, [#allocation8], %s4075_s30, %s4075_s30, %s3358_s12  }
  0x34   : > { %s4091_s3 = sld [smem:[#allocation36_spill]] }
  0x3a   : > { %s2980_s25 = scalar_lea.hbm %s4091_s3, 1024 }
  0x3b   : > { %p2981_p4 = scmp.ne.s32.totalorder %s4091_s3, %s2980_s25  ;;  %p2987_p12 = scmp.lt.u32.totalorder %s2980_s25, %s4091_s3 }
  0x3d   : > { %p2983_p10 = pnand %p2981_p4, %p3487_p8 }
  0x3f   : > { %p2984_p11 = pneg %p2983_p10 }
  0x41   : > { %p2989_p13 = pnand %p2987_p12, %p2984_p11 }
  0x43   : > { %2992 = shalt.err (!%p2989_p13)
}
  0x44   : > { %s2993_s22 = scalar_lea.vmem %s3475_s26, 1024  ;;  %p3001_p7 = scmp.lt.s32.totalorder %s3475_s26, %s3475_s26 }
  0x45   : > { %p2994_p0 = scmp.ne.s32.totalorder %s3475_s26, %s2993_s22  ;;  %p3002_p9 = scmp.lt.s32.totalorder %s2993_s22, %s2993_s22 }
  0x47   : > { %p2996_p2 = pnand %p2994_p0, %p3487_p8  ;;  %p3003_p4 = por %p3002_p9, %p3001_p7 }
  0x49   : > { %p2997_p5 = pneg %p2996_p2 }
  0x4b   : > { %p3004_p10 = pnand %p3003_p4, %p2997_p5 }
  0x4d   : > { %3007 = shalt.err (!%p3004_p10)
}
  0x4e   : > { %2756 = dma.hbm_to_vmem [thread:$0]  (!%p3471_p6), %s4091_s3, 1024, %s3475_s26, [#allocation11], %s4075_s30, %s4075_s30, %s3358_s12  }
  0x4f   : > { %s3008_s14 = scalar_lea.hbm %s4065_s5, 16 }
  0x50   : > { %p3009_p11 = scmp.ne.s32.totalorder %s4065_s5, %s3008_s14  ;;  %p3015_p0 = scmp.lt.u32.totalorder %s3008_s14, %s4065_s5 }
  0x52   : > { %p3011_p12 = pnand %p3009_p11, %p3487_p8 }
  0x54   : > { %p3012_p13 = pneg %p3011_p12 }
  0x56   : > { %p3017_p2 = pnand %p3015_p0, %p3012_p13 }
  0x58   : > { %3020 = shalt.err (!%p3017_p2)
}
  0x59   : > { %s3021_s26 = scalar_lea.vmem %s3477_s29, 16  ;;  %s3028_s22 = scalar_lea.vmem %s3477_s29, 32 }
  0x5a   : > { %p3022_p5 = scmp.ne.s32.totalorder %s3477_s29, %s3021_s26  ;;  %p3029_p4 = scmp.lt.s32.totalorder %s3477_s29, %s3477_s29 }
  0x5b   : > { %p3030_p10 = scmp.lt.s32.totalorder %s3028_s22, %s3021_s26 }
  0x5c   : > { %p3024_p7 = pnand %p3022_p5, %p3487_p8 }
  0x5d   : > { %p3031_p11 = por %p3030_p10, %p3029_p4 }
  0x5e   : > { %p3025_p9 = pneg %p3024_p7 }
  0x60   : > { %p3032_p12 = pnand %p3031_p11, %p3025_p9 }
  0x62   : > { %3035 = shalt.err (!%p3032_p12)
}
  0x63   : > { %2762 = dma.hbm_to_vmem [thread:$0]  (!%p3471_p6), %s4065_s5, 16, %s3477_s29, [#allocation14]  }
  0x64   : > { %s3359_s24 = smov [#allocation16]   ;;  %s3360_s14 = smov [#allocation9]  }
  0x65   : > { %s393_s13 = sshll.u32 %s3359_s24, 4  ;;  %s333_s15 = sshll.u32 %s3360_s14, 4  ;;  %s394_s13 = int_to_ptr.vmem [resolvable:$true] %s393_s13  ;;  %s334_s15 = int_to_ptr.vmem [resolvable:$true] %s333_s15 }
  0x66   : > { %s3036_s28 = scalar_lea.hbm %s4067_s7, 16 }
  0x67   : > { %p3037_p13 = scmp.ne.s32.totalorder %s4067_s7, %s3036_s28  ;;  %p3043_p5 = scmp.lt.u32.totalorder %s3036_s28, %s4067_s7 }
  0x69   : > { %p3039_p0 = pnand %p3037_p13, %p3487_p8 }
  0x6b   : > { %p3040_p2 = pneg %p3039_p0 }
  0x6d   : > { %p3045_p7 = pnand %p3043_p5, %p3040_p2 }
  0x6f   : > { %3048 = shalt.err (!%p3045_p7)
}
  0x70   : > { %s3049_s29 = scalar_lea.vmem %s394_s13, 16  ;;  %s3056_s11 = scalar_lea.vmem %s394_s13, 32 }
  0x71   : > { %p3050_p9 = scmp.ne.s32.totalorder %s394_s13, %s3049_s29  ;;  %p3057_p11 = scmp.lt.s32.totalorder %s394_s13, %s394_s13 }
  0x72   : > { %p3058_p12 = scmp.lt.s32.totalorder %s3056_s11, %s3049_s29 }
  0x73   : > { %p3052_p4 = pnand %p3050_p9, %p3487_p8 }
  0x74   : > { %p3059_p1 = por %p3058_p12, %p3057_p11 }
  0x75   : > { %p3053_p10 = pneg %p3052_p4 }
  0x77   : > { %p3060_p3 = pnand %p3059_p1, %p3053_p10 }
  0x79   : > { %3063 = shalt.err (!%p3060_p3)
}
  0x7a   : > { %2768 = dma.hbm_to_vmem [thread:$0]  (!%p3471_p6), %s4067_s7, 16, %s394_s13, [#allocation17]  }
  0x7b   : > { %s4092_s2 = sld [smem:[#allocation35_spill]] }
  0x81   : > { %s3064_s25 = scalar_lea.hbm %s4092_s2, 9216 }
  0x82   : > { %p3065_p13 = scmp.ne.s32.totalorder %s4092_s2, %s3064_s25  ;;  %p3071_p3 = scmp.lt.u32.totalorder %s3064_s25, %s4092_s2 }
  0x84   : > { %p3067_p0 = pnand %p3065_p13, %p3487_p8 }
  0x86   : > { %p3068_p1 = pneg %p3067_p0 }
  0x88   : > { %p3073_p2 = pnand %p3071_p3, %p3068_p1 }
  0x8a   : > { %3076 = shalt.err (!%p3073_p2)
}
  0x8b   : > { %s3077_s29 = scalar_lea.vmem %s334_s15, 9216  ;;  %p3085_p4 = scmp.lt.s32.totalorder %s334_s15, %s334_s15 }
  0x8c   : > { %p3078_p5 = scmp.ne.s32.totalorder %s334_s15, %s3077_s29  ;;  %p3086_p10 = scmp.lt.s32.totalorder %s3077_s29, %s3077_s29 }
  0x8e   : > { %p3080_p7 = pnand %p3078_p5, %p3487_p8  ;;  %p3087_p11 = por %p3086_p10, %p3085_p4 }
  0x90   : > { %p3081_p9 = pneg %p3080_p7 }
  0x92   : > { %p3088_p12 = pnand %p3087_p11, %p3081_p9 }
  0x94   : > { %3091 = shalt.err (!%p3088_p12)
}
  0x95   : > { %s4093_s13 = smov 64   ;;  %s3361_s14 = smov [#allocation12]  }
  0x96   : > { %2753 = dma.hbm_to_vmem [thread:$0]  (!%p3471_p6), %s4092_s2, 9216, %s334_s15, [#allocation8], %s4093_s13, %s4093_s13, %s3358_s12  }
  0x97   : > { %s360_s30 = sshll.u32 %s3361_s14, 4  ;;  %s3362_s21 = smov [#allocation15]   ;;  %s361_s30 = int_to_ptr.vmem [resolvable:$true] %s360_s30 }
  0x98   : > { %s382_s25 = sshll.u32 %s3362_s21, 4  ;;  %s3092_s22 = scalar_lea.hbm %s4064_s4, 16  ;;  %s383_s25 = int_to_ptr.vmem [resolvable:$true] %s382_s25 }
  0x99   : > { %p3093_p13 = scmp.ne.s32.totalorder %s4064_s4, %s3092_s22  ;;  %p3099_p3 = scmp.lt.u32.totalorder %s3092_s22, %s4064_s4 }
  0x9b   : > { %p3095_p0 = pnand %p3093_p13, %p3487_p8 }
  0x9d   : > { %p3096_p1 = pneg %p3095_p0 }
  0x9f   : > { %p3101_p2 = pnand %p3099_p3, %p3096_p1 }
  0xa1   : > { %3104 = shalt.err (!%p3101_p2)
}
  0xa2   : > { %s3105_s12 = scalar_lea.vmem %s361_s30, 16  ;;  %s3112_s15 = scalar_lea.vmem %s361_s30, 32 }
  0xa3   : > { %p3106_p5 = scmp.ne.s32.totalorder %s361_s30, %s3105_s12  ;;  %p3113_p4 = scmp.lt.s32.totalorder %s361_s30, %s361_s30 }
  0xa4   : > { %p3114_p10 = scmp.lt.s32.totalorder %s3112_s15, %s3105_s12 }
  0xa5   : > { %p3108_p7 = pnand %p3106_p5, %p3487_p8 }
  0xa6   : > { %p3115_p11 = por %p3114_p10, %p3113_p4 }
  0xa7   : > { %p3109_p9 = pneg %p3108_p7 }
  0xa9   : > { %p3116_p12 = pnand %p3115_p11, %p3109_p9 }
  0xab   : > { %3119 = shalt.err (!%p3116_p12)
}
  0xac   : > { %2759 = dma.hbm_to_vmem [thread:$0]  (!%p3471_p6), %s4064_s4, 16, %s361_s30, [#allocation11]  }
  0xad   : > { %s3120_s21 = scalar_lea.hbm %s4066_s6, 16 }
  0xae   : > { %p3121_p13 = scmp.ne.s32.totalorder %s4066_s6, %s3120_s21  ;;  %p3127_p3 = scmp.lt.u32.totalorder %s3120_s21, %s4066_s6 }
  0xb0   : > { %p3123_p0 = pnand %p3121_p13, %p3487_p8 }
  0xb2   : > { %p3124_p1 = pneg %p3123_p0 }
  0xb4   : > { %p3129_p2 = pnand %p3127_p3, %p3124_p1 }
  0xb6   : > { %3132 = shalt.err (!%p3129_p2)
}
  0xb7   : > { %s3133_s29 = scalar_lea.vmem %s383_s25, 16  ;;  %s3140_s30 = scalar_lea.vmem %s383_s25, 32 }
  0xb8   : > { %p3134_p5 = scmp.ne.s32.totalorder %s383_s25, %s3133_s29  ;;  %p3141_p4 = scmp.lt.s32.totalorder %s383_s25, %s383_s25 }
  0xb9   : > { %p3142_p10 = scmp.lt.s32.totalorder %s3140_s30, %s3133_s29 }
  0xba   : > { %p3136_p7 = pnand %p3134_p5, %p3487_p8 }
  0xbb   : > { %p3143_p11 = por %p3142_p10, %p3141_p4 }
  0xbc   : > { %p3137_p9 = pneg %p3136_p7 }
  0xbe   : > { %p3144_p12 = pnand %p3143_p11, %p3137_p9 }
  0xc0   : > { %3147 = shalt.err (!%p3144_p12)
}
  0xc1   : > { %2765 = dma.hbm_to_vmem [thread:$0]  (!%p3471_p6), %s4066_s6, 16, %s383_s25, [#allocation14]  }
  0xc2   : > { %s3363_s15 = smov [#allocation18]   ;;  %s3364_s24 = smov [#allocation19]  }
  0xc3   : > { %s404_s13 = sshll.u32 %s3363_s15, 4  ;;  %s415_s1 = sshll.u32 %s3364_s24, 4  ;;  %s405_s13 = int_to_ptr.vmem [resolvable:$true] %s404_s13  ;;  %s416_s1 = int_to_ptr.vmem [resolvable:$true] %s415_s1 }
  0xc4   : > { %s3148_s28 = scalar_lea.hbm %s4068_s8, 16 }
  0xc5   : > { %p3149_p13 = scmp.ne.s32.totalorder %s4068_s8, %s3148_s28  ;;  %p3155_p3 = scmp.lt.u32.totalorder %s3148_s28, %s4068_s8 }
  0xc7   : > { %p3151_p0 = pnand %p3149_p13, %p3487_p8 }
  0xc9   : > { %p3152_p1 = pneg %p3151_p0 }
  0xcb   : > { %p3157_p2 = pnand %p3155_p3, %p3152_p1 }
  0xcd   : > { %3160 = shalt.err (!%p3157_p2)
}
  0xce   : > { %s3161_s25 = scalar_lea.vmem %s405_s13, 16  ;;  %s3168_s30 = scalar_lea.vmem %s405_s13, 32 }
  0xcf   : > { %p3162_p5 = scmp.ne.s32.totalorder %s405_s13, %s3161_s25  ;;  %p3169_p4 = scmp.lt.s32.totalorder %s405_s13, %s405_s13 }
  0xd0   : > { %p3170_p10 = scmp.lt.s32.totalorder %s3168_s30, %s3161_s25 }
  0xd1   : > { %p3164_p7 = pnand %p3162_p5, %p3487_p8 }
  0xd2   : > { %p3171_p11 = por %p3170_p10, %p3169_p4 }
  0xd3   : > { %p3165_p9 = pneg %p3164_p7 }
  0xd5   : > { %p3172_p12 = pnand %p3171_p11, %p3165_p9 }
  0xd7   : > { %3175 = shalt.err (!%p3172_p12)
}
  0xd8   : > { %2771 = dma.hbm_to_vmem [thread:$0]  (!%p3471_p6), %s4068_s8, 16, %s405_s13, [#allocation17]  }
  0xd9   : > { %s3176_s14 = scalar_lea.hbm %s4069_s9, 16 }
  0xda   : > { %p3177_p13 = scmp.ne.s32.totalorder %s4069_s9, %s3176_s14  ;;  %p3183_p3 = scmp.lt.u32.totalorder %s3176_s14, %s4069_s9 }
  0xdc   : > { %p3179_p0 = pnand %p3177_p13, %p3487_p8 }
  0xde   : > { %p3180_p1 = pneg %p3179_p0 }
  0xe0   : > { %p3185_p2 = pnand %p3183_p3, %p3180_p1 }
  0xe2   : > { %3188 = shalt.err (!%p3185_p2)
}
  0xe3   : > { %s3189_s10 = scalar_lea.vmem %s416_s1, 16  ;;  %s3196_s13 = scalar_lea.vmem %s416_s1, 32 }
  0xe4   : > { %p3190_p5 = scmp.ne.s32.totalorder %s416_s1, %s3189_s10  ;;  %p3197_p4 = scmp.lt.s32.totalorder %s416_s1, %s416_s1 }
  0xe5   : > { %p3198_p10 = scmp.lt.s32.totalorder %s3196_s13, %s3189_s10 }
  0xe6   : > { %p3192_p7 = pnand %p3190_p5, %p3487_p8 }
  0xe7   : > { %p3199_p11 = por %p3198_p10, %p3197_p4 }
  0xe8   : > { %p3193_p9 = pneg %p3192_p7 }
  0xea   : > { %p3200_p12 = pnand %p3199_p11, %p3193_p9 }
  0xec   : > { %3203 = shalt.err (!%p3200_p12)
}
  0xed   : > { %2774 = dma.hbm_to_vmem [thread:$0]  (!%p3471_p6), %s4069_s9, 16, %s416_s1, [#allocation20]  }
  0xee   : > { %s2319_s16 = sadd.s32 4294967294, %s3352_s20   ;;  %s3674_s27 = sadd.s32 1, %s3352_s20  }
  0xef   : > { %s43_s30 = sadd.s32 1, %s3348_s19  ;;  %s40_s11 = ssub.s32 %s3352_s20, %s3674_s27 }
  0xf0   : > { %p50_p8 = scmp.ne.s32.totalorder %s3348_s19, %s3344_s18  ;;  %p41_p13 = scmp.eq.s32.totalorder %s40_s11, 0 }
  0xf1   : > { %p51_p0 = scmp.eq.s32.totalorder %s3352_s20, 0  ;;  %p56_p1 = scmp.ne.s32.totalorder %s3344_s18, %s3340_s17 }
  0xf2   : > { %p269_p3 = scmp.eq.s32.totalorder %s3455_s23, 1  ;;  %p4094_p5 = scmp.eq.s32.totalorder %s3455_s23, 0 }
  0xf3   : > { %s3686_s12 = scalar_select %p41_p13, %s3348_s19, %s43_s30  }
  0xf4   : > { %p52_p2 = por %p51_p0, %p50_p8  ;;  %p3690_p7 = por %p4094_p5, %p56_p1 }
  0xf5   : > { %p3694_p6 = por %p269_p3, %p50_p8  ;;  %p275_p9 = scmp.eq.s32.totalorder %s2319_s16, 1 }
  0xf6   : > { %p2795_p4 = scmp.lt.s32.totalorder %s3352_s20, 2  ;;  %s426_s24 = sand.u32 1, %s3348_s19  }
  0xf7   : > { %s4096_s1 = scalar_select %p3694_p6, 1, 0 }
  0xf8   : > { %p3700_p10 = por %p275_p9, %p56_p1  ;;  %s2331_s21 = sshll.u32 %s426_s24, 7 }
  0xf9   : > { %s2454_s28 = sshll.u32 %s3352_s20, 11  ;;  %s4098_s0 = sld [smem:[#allocation33_spill]] }
  0xfa   : > { %s4097_s14 = scalar_select %p3700_p10, 1, 0 }
  0xfb   : > { %s430_s13 = scalar_lea.vmem [#allocation4], %s2331_s21  ;;  %p3710_p11 = pnand %p2795_p4, %p52_p2 }
  0xfc   : > { %s437_s29 = sshll.u32 %s430_s13, 4  ;;  %s3716_s16 = scalar_lea.sflag [#allocation5], %s426_s24  ;;  %s3714_s29 = int_to_ptr.vmem [resolvable:$true] %s437_s29 }
  0xfd   : > { %p3206_p8 = pneg %p3710_p11 }
  0xff   : > { %s3708_s10 = scalar_lea.hbm %s4098_s0, %s2454_s28  ;;  %s3209_s28 = scalar_lea.hbm %s4098_s0, 4096 }
 0x100   : > { %s3204_s30 = scalar_lea.hbm %s3708_s10, 2048  ;;  %p3210_p1 = scmp.lt.u32.totalorder %s3708_s10, %s4098_s0 }
 0x101   : > { %p3205_p12 = scmp.ne.s32.totalorder %s3708_s10, %s3204_s30  ;;  %p3211_p3 = scmp.lt.u32.totalorder %s3209_s28, %s3204_s30 }
 0x102   : > { %p3213_p5 = scmp.lt.u32.totalorder %s3204_s30, %s3708_s10 }
 0x103   : > { %p3207_p13 = pnand %p3206_p8, %p3205_p12  ;;  %p3212_p2 = por %p3211_p3, %p3210_p1 }
 0x105   : > { %p3208_p0 = pneg %p3207_p13  ;;  %p3214_p9 = por %p3213_p5, %p3212_p2 }
 0x107   : > { %p3215_p4 = pnand %p3214_p9, %p3208_p0 }
 0x109   : > { %3218 = shalt.err (!%p3215_p4)
}
 0x10a   : > { %s3219_s24 = scalar_lea.vmem %s3714_s29, 2048  ;;  %s3365_s13 = smov [#allocation4]  }
 0x10b   : > { %p3220_p12 = scmp.ne.s32.totalorder %s3714_s29, %s3219_s24  ;;  %s3224_s11 = sshll.u32 %s3365_s13, 4  ;;  %s3225_s11 = int_to_ptr.vmem [resolvable:$false] %s3224_s11 }
 0x10c   : > { %s3226_s21 = scalar_lea.vmem %s3225_s11, 4096  ;;  %p3227_p6 = scmp.lt.s32.totalorder %s3714_s29, %s3225_s11 }
 0x10d   : > { %p3222_p13 = pnand %p3220_p12, %p3206_p8  ;;  %p3228_p1 = scmp.lt.s32.totalorder %s3226_s21, %s3219_s24 }
 0x10f   : > { %p3223_p10 = pneg %p3222_p13  ;;  %p3229_p3 = por %p3228_p1, %p3227_p6 }
 0x111   : > { %p3230_p2 = pnand %p3229_p3, %p3223_p10 }
 0x113   : > { %3233 = shalt.err (!%p3230_p2)
}
 0x114   : > { %s3366_s30 = smov 256   ;;  %s3367_s28 = smov 16  }
 0x115   : > { %2778 = dma.hbm_to_vmem [thread:$0]  (!%p3710_p11), %s3708_s10, 2048, %s3714_s29, %s3716_s16, %s3366_s30, %s3366_s30, %s3367_s28  }
 0x116   : > { %s4100_s26 = sld [smem:[#allocation32_spill]] }
 0x11c   : > { %p4101_p8 = scmp.ne.s32.totalorder %s4100_s26, 0 }
 0x11d   : > { %s3747_s22 = sand.u32 (!%p4101_p8), 1, %s3344_s18  }
 0x11e   : > { %449 = sbr.rel (%p4101_p8) target bundleno = 1152 (0x480), region = 60  ;;  %s2335_s24 = sshll.u32 (!%p4101_p8), %s3747_s22, 7 }
 0x11f   : > { %s452_s13 = scalar_lea.sflag (!%p4101_p8), [#allocation5], %s3747_s22  ;;  %s3751_s11 = scalar_lea.vmem (!%p4101_p8), [#allocation4], %s2335_s24 }
 0x125   : > { %3307 = dma.done.wait (%p3690_p7), %s452_s13, 2048  }
 0x126   : > { %3309 = vsyncadd (%p3690_p7), %s452_s13, 4294965248  ;;  %p4102_p6 = scmp.eq.s32.totalorder %s3455_s23, 0 }
 0x128   : > { %3311 = dma.done.wait (%p4102_p6), [#allocation8], 10304   ;;  %p4103_p10 = pmov %p4102_p6 }
 0x129   : > { %p4104_p11 = pmov %p4102_p6 }
 0x12a   : > { %3313 = vsyncadd (%p4103_p10), [#allocation8], 4294956992 }
 0x12b   : > { %3315 = dma.done.wait (%p4104_p11), [#allocation11], 1040   ;;  %p4105_p0 = pmov %p4102_p6 }
 0x12d   : > { %3317 = vsyncadd (%p4105_p0), [#allocation11], 4294966256  ;;  %p4106_p5 = pmov %p4105_p0 }
 0x12e   : > { %p4107_p9 = pmov %p4105_p0 }
 0x12f   : > { %3319 = dma.done.wait (%p4106_p5), [#allocation14], 32  }
 0x130   : > { %3321 = vsyncadd (%p4107_p9), [#allocation14], 4294967264  ;;  %p4108_p7 = pmov %p4105_p0 }
 0x131   : > { %p4109_p4 = pmov %p4105_p0 }
 0x132   : > { %3323 = dma.done.wait (%p4108_p7), [#allocation17], 32  }
 0x133   : > { %3325 = vsyncadd (%p4109_p4), [#allocation17], 4294967264  ;;  %p4110_p12 = pmov %p4105_p0 }
 0x134   : > { %p4111_p13 = pmov %p4105_p0 }
 0x135   : > { %3327 = dma.done.wait (%p4110_p12), [#allocation20], 16  }
 0x136   : > { %3329 = vsyncadd (%p4111_p13), [#allocation20], 4294967280  ;;  %v3368_v0 = vmov 0   ;;  %v2855_v1 = vld [vmem:[#allocation7] sm:$0xff]   ;;  %v2856_v2 = vld [vmem:[#allocation7 + $0x8] sm:$0xff]   ;;  %vm628_vm0 = vcmask 64512  }
 0x137   : > { %645 = vmatprep.subr.bf16.mxu0 %v3368_v0  ;;  %v2857_v3 = vld [vmem:[#allocation7 + $0x10] sm:$0xff]   ;;  %v537_v4 = vld [vmem:[%s3751_s11 + $0x8] sm:$0xff]  ;;  %v539_v5 = vld [vmem:[%s3751_s11 + $0x18] sm:$0xff]  ;;  %vm641_vm1 = vcmask 1043456   ;;  %v3369_v52 = vmov 0.0   ;;  %s2345_s15 = sshll.u32 %s3747_s22, 6 }
 0x138   : > { %646 = vmatpush1.bf16.msra.mxu0 %v2855_v1  ;;  %v2858_v6 = vld [vmem:[#allocation7 + $0x18] sm:$0xff]   ;;  %v553_v7 = vpack.c.bf16 %v539_v5, %v537_v4  ;;  %v2859_v8 = vld [vmem:[#allocation7 + $0x20] sm:$0xff]   ;;  %v2867_v11 = vld [vmem:[#allocation9 + $0x48] sm:$0xff]   ;;  %748 = vst [vmem:[#allocation2] sm:$0xff] %v3369_v52  ;;  %s3937_s10 = scalar_lea.vmem [#allocation22], %s2345_s15  ;;  %s3947_s29 = scalar_lea.vmem [#allocation21], %s2345_s15 }
 0x139   : > { %647 = vmatprep.subr.bf16.mxu0 %v3368_v0  ;;  %v2864_v9 = vld [vmem:[#allocation9 + $0x40] sm:$0xff]   ;;  %v2869_v13 = vld [vmem:[#allocation9 + $0x8] sm:$0xff]   ;;  %v2871_v15 = vld [vmem:[#allocation9 + $0x50] sm:$0xff]   ;;  %749 = vst [vmem:[#allocation2 + $0x8] sm:$0x3] %v3369_v52  ;;  %s2128_s25 = sshll.u32 %s3937_s10, 4  ;;  %s3955_s25 = int_to_ptr.vmem [resolvable:$true] %s2128_s25 }
 0x13a   : > { %2356 = vmatprep.mubr.msk.bf16.mxu0 %vm628_vm0, %v553_v7  ;;  %v2865_v10 = vld [vmem:[#allocation9] sm:$0xff]   ;;  %2457 = vmatprep.subr.bf16.mxu1 %v2864_v9  ;;  %v2861_v14 = vld [vmem:[#allocation7 + $0x30] sm:$0xff]   ;;  %v2863_v16 = vld [vmem:[#allocation7 + $0x40] ss:$0 sps:$4 sm:$0xff]   ;;  %751 = vst [vmem:[#allocation2 + $0x90] sm:$0xff] %v3369_v52  ;;  %s4079_s16 = sshll.u32 %s3455_s23, 10 }
 0x13b   : > { %2458 = vmatpush3.bf16.msra.mxu1 %v2865_v10  ;;  %v2860_v12 = vld [vmem:[#allocation7 + $0x28] sm:$0xff]   ;;  %v2873_v17 = vld [vmem:[#allocation9 + $0x10] sm:$0xff]   ;;  %v2875_v18 = vld [vmem:[#allocation9 + $0x58] sm:$0xff]   ;;  %v643_v20 = vsel %vm641_vm1, %v2863_v16, 0  ;;  %752 = vst [vmem:[#allocation2 + $0x98] sm:$0x3] %v3369_v52 }
 0x13c   : > { %648 = vmatpush1.bf16.msra.mxu0 %v2856_v2  ;;  %2459 = vmatprep.subr.bf16.mxu1 %v2867_v11  ;;  %v2862_v19 = vld [vmem:[#allocation7 + $0x38] sm:$0xff]   ;;  %v536_v22 = vld [vmem:[%s3751_s11] sm:$0xff]  ;;  %v538_v23 = vld [vmem:[%s3751_s11 + $0x10] sm:$0xff]  ;;  %754 = vst [vmem:[#allocation2 + $0x10] sm:$0x1] %v3369_v52  ;;  %s4112_s28 = sld [smem:[#allocation38_spill]] }
 0x13d   : > { %649 = vmatprep.subr.bf16.mxu0 %v3368_v0  ;;  %v2877_v21 = vld [vmem:[#allocation9 + $0x18] sm:$0xff]   ;;  %v541_v24 = vld [vmem:[%s3751_s11 + $0x28] sm:$0xff]  ;;  %v552_v28 = vpack.c.bf16 %v538_v23, %v536_v22  ;;  %v542_v32 = vld [vmem:[%s3751_s11 + $0x30] sm:$0xff]  ;;  %755 = vst [vmem:[#allocation2 + $0x20] sm:$0x1] %v3369_v52  ;;  %s3234_s15 = scalar_lea.vmem %s3955_s25, 1024 }
 0x13e   : > { %v543_v25 = vld [vmem:[%s3751_s11 + $0x38] sm:$0xff]  ;;  %v2866_v26 = vld [vmem:[#allocation9 + $0x140] sm:$0xff]   ;;  %v2870_v29 = vld [vmem:[#allocation9 + $0x148] sm:$0xff]   ;;  %756 = vst [vmem:[#allocation2 + $0x30] sm:$0x1] %v3369_v52  ;;  %p3235_p1 = scmp.ne.s32.totalorder %s3955_s25, %s3234_s15  ;;  %p4113_p3 = scmp.ne.s32.totalorder %s4096_s1, 0 }
 0x13f   : > { %2460 = vmatpush3.bf16.msra.mxu1 %v2869_v13  ;;  %v2868_v27 = vld [vmem:[#allocation9 + $0x100] sm:$0xff]   ;;  %v555_v30 = vpack.c.bf16 %v543_v25, %v541_v24  ;;  %v2872_v33 = vld [vmem:[#allocation9 + $0x108] sm:$0xff]   ;;  %v547_v35 = vld [vmem:[%s3751_s11 + $0x58] sm:$0xff]  ;;  %757 = vst [vmem:[#allocation2 + $0x40] sm:$0x1] %v3369_v52  ;;  %s3370_s21 = smov [#allocation22]  }
 0x140   : > { %650 = vmatpush1.bf16.msra.mxu0 %v2857_v3  ;;  %2461 = vmatprep.subr.bf16.mxu1 %v2871_v15  ;;  %v540_v31 = vld [vmem:[%s3751_s11 + $0x20] sm:$0xff]  ;;  %v545_v34 = vld [vmem:[%s3751_s11 + $0x48] sm:$0xff]  ;;  %v2874_v36 = vld [vmem:[#allocation9 + $0x150] sm:$0xff]   ;;  %758 = vst [vmem:[#allocation2 + $0x50] sm:$0x1] %v3369_v52  ;;  %p3236_p2 = pnand %p3235_p1, %p4113_p3  ;;  %s3238_s30 = sshll.u32 %s3370_s21, 4  ;;  %s3239_s30 = int_to_ptr.vmem [resolvable:$false] %s3238_s30 }
 0x141   : > { %651 = vmatprep.subr.bf16.mxu0 %v3368_v0  ;;  %v2876_v37 = vld [vmem:[#allocation9 + $0x110] sm:$0xff]   ;;  %v554_v38 = vpack.c.bf16 %v542_v32, %v540_v31  ;;  %v557_v39 = vpack.c.bf16 %v547_v35, %v545_v34  ;;  %v544_v40 = vld [vmem:[%s3751_s11 + $0x40] sm:$0xff]  ;;  %v549_v42 = vld [vmem:[%s3751_s11 + $0x68] sm:$0xff]  ;;  %759 = vst [vmem:[#allocation2 + $0x60] sm:$0x1] %v3369_v52  ;;  %p3241_p6 = scmp.lt.s32.totalorder %s3955_s25, %s3239_s30 }
 0x142   : > { %v546_v41 = vld [vmem:[%s3751_s11 + $0x50] sm:$0xff]  ;;  %v551_v43 = vld [vmem:[%s3751_s11 + $0x78] sm:$0xff]  ;;  %v548_v46 = vld [vmem:[%s3751_s11 + $0x60] sm:$0xff]  ;;  %760 = vst [vmem:[#allocation2 + $0x70] sm:$0x1] %v3369_v52  ;;  %s3966_s26 = scalar_lea.hbm %s4112_s28, %s4079_s16  ;;  %p3237_p8 = pneg %p3236_p2 }
 0x143   : > { %2462 = vmatpush3.bf16.msra.mxu1 %v2873_v17  ;;  %v556_v44 = vpack.c.bf16 %v546_v41, %v544_v40  ;;  %v559_v45 = vpack.c.bf16 %v551_v43, %v549_v42  ;;  %v550_v47 = vld [vmem:[%s3751_s11 + $0x70] sm:$0xff]  ;;  %v2878_v49 = vld [vmem:[#allocation9 + $0x158] sm:$0xff]   ;;  %v2879_v50 = vld [vmem:[#allocation9 + $0x60] sm:$0xff]   ;;  %761 = vst [vmem:[#allocation2 + $0x80] sm:$0x1] %v3369_v52  ;;  %s3240_s16 = scalar_lea.vmem %s3239_s30, 2048 }
 0x144   : > { %652 = vmatpush1.bf16.msra.mxu0 %v2858_v6  ;;  %2463 = vmatprep.subr.bf16.mxu1 %v2875_v18  ;;  %v558_v48 = vpack.c.bf16 %v550_v47, %v548_v46  ;;  %v2880_v51 = vld [vmem:[#allocation9 + $0x118] sm:$0xff]   ;;  %762 = vst [vmem:[#allocation2 + $0x19] sm:$0x1] %v3369_v52  ;;  %763 = vst [vmem:[#allocation2 + $0x29] sm:$0x1] %v3369_v52  ;;  %v2881_v53 = vld [vmem:[#allocation9 + $0x20] sm:$0xff]   ;;  %p3242_p10 = scmp.lt.s32.totalorder %s3240_s16, %s3234_s15 }
 0x145   : > { %653 = vmatprep.subr.bf16.mxu0 %v3368_v0  ;;  %764 = vst [vmem:[#allocation2 + $0x39] sm:$0x1] %v3369_v52  ;;  %765 = vst [vmem:[#allocation2 + $0x49] sm:$0x1] %v3369_v52  ;;  %v2882_v54 = vld [vmem:[#allocation9 + $0x160] sm:$0xff]   ;;  %v2883_v55 = vld [vmem:[#allocation9 + $0x68] sm:$0xff]  }
 0x146   : > { %766 = vst [vmem:[#allocation2 + $0x59] sm:$0x1] %v3369_v52  ;;  %767 = vst [vmem:[#allocation2 + $0x69] sm:$0x1] %v3369_v52  ;;  %v2884_v56 = vld [vmem:[#allocation9 + $0x120] sm:$0xff]   ;;  %v2885_v57 = vld [vmem:[#allocation9 + $0x28] sm:$0xff]   ;;  %p3243_p11 = por %p3242_p10, %p3241_p6 }
 0x147   : > { %2464 = vmatpush3.bf16.msra.mxu1 %v2877_v21  ;;  %768 = vst [vmem:[#allocation2 + $0x79] sm:$0x1] %v3369_v52  ;;  %769 = vst [vmem:[#allocation2 + $0x89] sm:$0x1] %v3369_v52  ;;  %v2886_v58 = vld [vmem:[#allocation9 + $0x168] sm:$0xff]   ;;  %v2887_v59 = vld [vmem:[#allocation9 + $0x70] sm:$0xff]  }
 0x148   : > { %654 = vmatpush1.bf16.msra.mxu0 %v2859_v8  ;;  %2465 = vmatprep.subr.bf16.mxu1 %v2879_v50  ;;  %v2888_v60 = vld [vmem:[#allocation9 + $0x128] sm:$0xff]   ;;  %v2889_v61 = vld [vmem:[#allocation9 + $0x30] sm:$0xff]   ;;  %v2891_v63 = vld [vmem:[#allocation9 + $0x78] sm:$0xff]   ;;  %p3244_p0 = pnand %p3243_p11, %p3237_p8 }
 0x149   : > { %655 = vmatprep.subr.bf16.mxu0 %v3368_v0  ;;  %v2890_v62 = vld [vmem:[#allocation9 + $0x170] sm:$0xff]   ;;  %v2893_v1 = vld [vmem:[#allocation9 + $0x38] sm:$0xff]   ;;  %v2895_v3 = vld [vmem:[#allocation9 + $0xc0] sm:$0xff]  }
 0x14a   : > { %v2894_v2 = vld [vmem:[#allocation9 + $0x178] sm:$0xff]   ;;  %v2898_v5 = vld [vmem:[#allocation9 + $0x200] sm:$0xff]   ;;  %v2899_v34 = vld [vmem:[#allocation9 + $0xc8] sm:$0xff]  }
 0x14b   : > { %2466 = vmatpush3.bf16.msra.mxu1 %v2881_v53  ;;  %v2896_v4 = vld [vmem:[#allocation9 + $0x138] sm:$0xff]   ;;  %v3817_v6 = vld [vmem:[#allocation12] ss:$0 sm:$0xff]  ;;  %v3819_v8 = vld [vmem:[#allocation13] ss:$0 sm:$0xff] }
 0x14c   : > { %656 = vmatpush1.bf16.msra.mxu0 %v2860_v12  ;;  %2467 = vmatprep.subr.bf16.mxu1 %v2883_v55  ;;  %v794_v15 = vld [vmem:[#allocation2 + $0x1] sm:$0xff]  ;;  %v2903_v53 = vld [vmem:[#allocation9 + $0x90] sm:$0xff]  }
 0x14d   : > { %657 = vmatprep.subr.bf16.mxu0 %v3368_v0  ;;  %v2897_v31 = vld [vmem:[#allocation9 + $0x80] sm:$0xff]  }
 0x14f   : > { %2468 = vmatpush3.bf16.msra.mxu1 %v2885_v57 }
 0x150   : > { %658 = vmatpush1.bf16.msra.mxu0 %v2861_v14  ;;  %2469 = vmatprep.subr.bf16.mxu1 %v2887_v59  ;;  %v2905_v59 = vld [vmem:[#allocation9 + $0xd8] sm:$0xff]  }
 0x151   : > { %659 = vmatprep.subr.bf16.mxu0 %v3368_v0 }
 0x153   : > { %2470 = vmatpush3.bf16.msra.mxu1 %v2889_v61 }
 0x154   : > { %660 = vmatpush1.bf16.msra.mxu0 %v2862_v19  ;;  %2471 = vmatprep.subr.bf16.mxu1 %v2891_v63 }
 0x155   : > { %661 = vmatprep.subr.bf16.mxu0 %v3368_v0  ;;  %v2892_v0 = vld [vmem:[#allocation9 + $0x130] sm:$0xff]  }
 0x157   : > { %2472 = vmatpush3.bf16.msra.mxu1 %v2893_v1 }
 0x158   : > { %662 = vmatpush1.bf16.msra.mxu0 %v643_v20  ;;  %2497 = vmatprep.subr.bf16.mxu1 %v2895_v3 }
 0x159   : > { %2537 = vmatprep.subr.bf16.mxu0 %v2866_v26 }
 0x15b   : > { %678 = vmatmul.mubr.bf16.vlgmr.msra.gmra.mrb[0].mxu0 %v552_v28 }
 0x15c   : > { %2357 = vmatprep.mubr.msk.bf16.mxu0 %vm628_vm0, %v555_v30  ;;  %2538 = vmatpush3.bf16.msra.mxu0 %v2868_v27 }
 0x15d   : > { %2539 = vmatprep.subr.bf16.mxu0 %v2870_v29 }
 0x160   : > { %2540 = vmatpush3.bf16.msra.mxu0 %v2872_v33 }
 0x161   : > { %2541 = vmatprep.subr.bf16.mxu0 %v2874_v36 }
 0x163   : > { %686 = vmatmul.mubr.bf16.gmra.mrb[4].mxu0 %v554_v38 }
 0x164   : > { %2358 = vmatprep.mubr.msk.bf16.mxu0 %vm628_vm0, %v557_v39  ;;  %2542 = vmatpush3.bf16.msra.mxu0 %v2876_v37 }
 0x165   : > { %2543 = vmatprep.subr.bf16.mxu0 %v2878_v49  ;;  %v2902_v49 = vld [vmem:[#allocation9 + $0xd0] sm:$0xff]  }
 0x168   : > { %2544 = vmatpush3.bf16.msra.mxu0 %v2880_v51 }
 0x169   : > { %2545 = vmatprep.subr.bf16.mxu0 %v2882_v54 }
 0x16b   : > { %694 = vmatmul.mubr.bf16.gmra.mrb[8].mxu0 %v556_v44  ;;  %v2900_v44 = vld [vmem:[#allocation9 + $0x88] sm:$0xff]  }
 0x16c   : > { %2359 = vmatprep.mubr.msk.bf16.mxu0 %vm628_vm0, %v559_v45  ;;  %2546 = vmatpush3.bf16.msra.mxu0 %v2884_v56  ;;  %v2901_v45 = vld [vmem:[#allocation9 + $0x208] sm:$0xff]   ;;  %v2904_v56 = vld [vmem:[#allocation9 + $0x210] sm:$0xff]  }
 0x16d   : > { %2547 = vmatprep.subr.bf16.mxu0 %v2886_v58 }
 0x170   : > { %2548 = vmatpush3.bf16.msra.mxu0 %v2888_v60 }
 0x171   : > { %2549 = vmatprep.subr.bf16.mxu0 %v2890_v62 }
 0x173   : > { %702 = vmatmul.mubr.bf16.gmra.mrb[12].mxu0 %v558_v48 }
 0x174   : > { %2550 = vmatpush3.bf16.msra.mxu0 %v2892_v0 }
 0x175   : > { %2551 = vmatprep.subr.bf16.mxu0 %v2894_v2 }
 0x178   : > { %2552 = vmatpush3.bf16.msra.mxu0 %v2896_v4 }
 0x179   : > { %2641 = vmatprep.subr.bf16.mxu0 %v2898_v5 }
 0x22e   : > { %v679_v7 = vpop.f32.mrb[0].mxu0 }
 0x22f   : > { %v717_v9 = vmul.f32 %v3817_v6, %v679_v7  ;;  %v681_v10 = vpop.f32.mrb[1].mxu0  ;;  %v2907_v7 = vld [vmem:[#allocation9 + $0x218] sm:$0xff]  }
 0x230   : > { %v682_v11 = vpop.f32.mrb[2].mxu0 }
 0x231   : > { %v732_v12 = vadd.f32 %v3819_v8, %v717_v9  ;;  %v718_v13 = vmul.f32 %v3817_v6, %v682_v11  ;;  %v684_v14 = vpop.f32.mrb[3].mxu0 }
 0x233   : > { %v740_v16 = vmax.f32 %v732_v12, 0.0  ;;  %v733_v17 = vadd.f32 %v3819_v8, %v718_v13  ;;  %v2908_v12 = vld [vmem:[#allocation9 + $0xe0] sm:$0xff]  }
 0x235   : > { %770 = vst [vmem:[#allocation2 + $0x11] sm:$0xff] %v740_v16  ;;  %v741_v18 = vmax.f32 %v733_v17, 0.0  ;;  %v802_v19 = vpack.c.bf16 %v740_v16, %v794_v15  ;;  %v2909_v15 = vld [vmem:[#allocation9 + $0xa0] sm:$0xff]  }
 0x236   : > { %v687_v20 = vpop.f32.mrb[4].mxu0 }
 0x237   : > { %771 = vst [vmem:[#allocation2 + $0x21] sm:$0xff] %v741_v18  ;;  %v719_v21 = vmul.f32 %v3817_v6, %v687_v20  ;;  %v689_v22 = vpop.f32.mrb[5].mxu0  ;;  %1567 = vmatprep.mubr.bf16.mxu1 %v802_v19  ;;  %v850_v23 = vpack.c.bf16 %v741_v18, %v740_v16  ;;  %v2911_v20 = vld [vmem:[#allocation9 + $0xe8] sm:$0xff]  }
 0x238   : > { %v690_v24 = vpop.f32.mrb[6].mxu0 }
 0x239   : > { %v734_v25 = vadd.f32 %v3819_v8, %v719_v21  ;;  %v720_v26 = vmul.f32 %v3817_v6, %v690_v24  ;;  %v692_v27 = vpop.f32.mrb[7].mxu0 }
 0x23a   : > { %v2914_v27 = vld [vmem:[#allocation9 + $0xf0] sm:$0xff]  }
 0x23b   : > { %v3828_v28 = vmax.f32 %v734_v25, 0.0  ;;  %v735_v29 = vadd.f32 %v3819_v8, %v720_v26  ;;  %v2912_v25 = vld [vmem:[#allocation9 + $0xa8] sm:$0xff]  }
 0x23c   : > { %v3831_v30 = vld [vmem:[#allocation2 + $0x10] sm:$0xff] }
 0x23d   : > { %772 = vst [vmem:[#allocation2 + $0x31] sm:$0xff] %v3828_v28  ;;  %v743_v32 = vmax.f32 %v735_v29, 0.0  ;;  %v786_v33 = vpack.c.bf16 %v3831_v30, %v3369_v52  ;;  %v3837_v35 = vpack.c.bf16 %v3828_v28, %v741_v18  ;;  %v3839_v37 = vld [vmem:[#allocation2 + $0x12] sm:$0xff]  ;;  %v2910_v18 = vld [vmem:[#allocation9 + $0x220] sm:$0xff]  }
 0x23e   : > { %v695_v36 = vpop.f32.mrb[8].mxu0  ;;  %v3841_v38 = vld [vmem:[#allocation2 + $0x22] sm:$0xff]  ;;  %v2913_v26 = vld [vmem:[#allocation9 + $0x228] sm:$0xff]  }
 0x23f   : > { %773 = vst [vmem:[#allocation2 + $0x41] sm:$0xff] %v743_v32  ;;  %v721_v39 = vmul.f32 %v3817_v6, %v695_v36  ;;  %v697_v40 = vpop.f32.mrb[9].mxu0  ;;  %1568 = vmatmul.mubr.bf16.vlgmr.msra.gmra.mrb[0].mxu1 %v786_v33  ;;  %v866_v41 = vpack.c.bf16 %v3841_v38, %v3839_v37  ;;  %v851_v42 = vpack.c.bf16 %v743_v32, %v3828_v28  ;;  %v3853_v54 = vld [vmem:[#allocation2 + $0x20] sm:$0xff]  ;;  %v2916_v33 = vld [vmem:[#allocation9 + $0x230] sm:$0xff]  }
 0x240   : > { %v698_v43 = vpop.f32.mrb[10].mxu0  ;;  %2498 = vmatpush3.bf16.msra.mxu1 %v2897_v31  ;;  %1575 = vmatprep.mubr.bf16.mxu1 %v3837_v35  ;;  %v2915_v31 = vld [vmem:[#allocation9 + $0xb0] sm:$0xff]   ;;  %v2917_v40 = vld [vmem:[#allocation9 + $0xf8] sm:$0xff]  }
 0x241   : > { %v736_v46 = vadd.f32 %v3819_v8, %v721_v39  ;;  %v722_v47 = vmul.f32 %v3817_v6, %v698_v43  ;;  %v700_v48 = vpop.f32.mrb[11].mxu0  ;;  %1697 = vmatprep.mubr.bf16.mxu0 %v866_v41  ;;  %2499 = vmatprep.subr.bf16.mxu1 %v2899_v34  ;;  %v834_v34 = vpack.c.bf16 %v3853_v54, %v3831_v30  ;;  %v2919_v43 = vld [vmem:[#allocation9 + $0x238] sm:$0xff]  }
 0x242   : > { %1698 = vmatmul.mubr.bf16.vlgmr.msra.gmra.mrb[16].mxu0 %v850_v23  ;;  %v810_v30 = vld [vmem:[#allocation2 + $0x2] sm:$0xff]  ;;  %v2922_v48 = vld [vmem:[#allocation9 + $0x1c8] sm:$0xff]  }
 0x243   : > { %v3850_v50 = vmax.f32 %v736_v46, 0.0  ;;  %v737_v51 = vadd.f32 %v3819_v8, %v722_v47  ;;  %2642 = vmatpush3.bf16.msra.mxu0 %v2898_v5  ;;  %v2906_v5 = vld [vmem:[#allocation9 + $0x98] sm:$0xff]   ;;  %v2921_v46 = vld [vmem:[#allocation9 + $0x180] sm:$0xff]   ;;  %v818_v47 = vpack.c.bf16 %v3839_v37, %v810_v30  ;;  %v914_v37 = vld [vmem:[#allocation2 + $0x92] sm:$0xff] }
 0x244   : > { %2500 = vmatpush3.bf16.msra.mxu1 %v2900_v44  ;;  %2643 = vmatprep.subr.bf16.mxu0 %v2901_v45  ;;  %v3855_v55 = vld [vmem:[#allocation2 + $0x30] sm:$0xff] }
 0x245   : > { %774 = vst [vmem:[#allocation2 + $0x51] sm:$0xff] %v3850_v50  ;;  %v745_v57 = vmax.f32 %v737_v51, 0.0  ;;  %2501 = vmatprep.subr.bf16.mxu1 %v2902_v49  ;;  %v3860_v58 = vpack.c.bf16 %v3855_v55, %v3853_v54  ;;  %v3863_v60 = vpack.c.bf16 %v3850_v50, %v743_v32  ;;  %v3865_v62 = vld [vmem:[#allocation2 + $0x32] sm:$0xff] }
 0x246   : > { %v703_v61 = vpop.f32.mrb[12].mxu0  ;;  %v3867_v63 = vld [vmem:[#allocation2 + $0x42] sm:$0xff]  ;;  %v915_v44 = vpack.c.bf16 %v3865_v62, %v3841_v38  ;;  %v2925_v54 = vld [vmem:[#allocation9 + $0x190] sm:$0xff]  }
 0x247   : > { %775 = vst [vmem:[#allocation2 + $0x61] sm:$0xff] %v745_v57  ;;  %v723_v0 = vmul.f32 %v3817_v6, %v703_v61  ;;  %v705_v1 = vpop.f32.mrb[13].mxu0  ;;  %2644 = vmatpush3.bf16.msra.mxu0 %v2901_v45  ;;  %1576 = vmatmul.mubr.bf16.gmra.mrb[4].mxu1 %v3860_v58  ;;  %v867_v2 = vpack.c.bf16 %v3867_v63, %v3865_v62  ;;  %v3878_v16 = vld [vmem:[#allocation2 + $0x40] sm:$0xff] }
 0x248   : > { %v852_v3 = vpack.c.bf16 %v745_v57, %v3850_v50  ;;  %v706_v4 = vpop.f32.mrb[14].mxu0  ;;  %2502 = vmatpush3.bf16.msra.mxu1 %v2903_v53  ;;  %2645 = vmatprep.subr.bf16.mxu0 %v2904_v56  ;;  %v2920_v45 = vld [vmem:[#allocation9 + $0x1c0] sm:$0xff]   ;;  %v835_v49 = vpack.c.bf16 %v3878_v16, %v3855_v55  ;;  %v2923_v50 = vld [vmem:[#allocation9 + $0x188] sm:$0xff]   ;;  %v2924_v53 = vld [vmem:[#allocation9 + $0x1d0] sm:$0xff]  }
 0x249   : > { %v738_v9 = vadd.f32 %v3819_v8, %v723_v0  ;;  %v724_v10 = vmul.f32 %v3817_v6, %v706_v4  ;;  %v708_v11 = vpop.f32.mrb[15].mxu0  ;;  %1705 = vmatprep.mubr.bf16.mxu0 %v867_v2  ;;  %2503 = vmatprep.subr.bf16.mxu1 %v2905_v59  ;;  %v2927_v59 = vld [vmem:[#allocation9 + $0x198] sm:$0xff]   ;;  %v2928_v61 = vld [vmem:[#allocation9 + $0x1e0] sm:$0xff]   ;;  %v2930_v0 = vld [vmem:[#allocation9 + $0x1e8] sm:$0xff]  }
 0x24a   : > { %1706 = vmatmul.mubr.bf16.gmra.mrb[20].mxu0 %v851_v42  ;;  %1583 = vmatprep.mubr.bf16.mxu1 %v3863_v60  ;;  %v2918_v42 = vld [vmem:[#allocation9 + $0xb8] sm:$0xff]   ;;  %v2931_v2 = vld [vmem:[#allocation9 + $0x1a8] sm:$0xff]   ;;  %v2933_v4 = vld [vmem:[#allocation9 + $0x1b0] sm:$0xff]  }
 0x24b   : > { %v746_v13 = vmax.f32 %v738_v9, 0.0  ;;  %v739_v14 = vadd.f32 %v3819_v8, %v724_v10  ;;  %2646 = vmatpush3.bf16.msra.mxu0 %v2904_v56  ;;  %v2926_v56 = vld [vmem:[#allocation9 + $0x1d8] sm:$0xff]   ;;  %v898_v9 = vld [vmem:[#allocation2 + $0x91] sm:$0xff] }
 0x24c   : > { %2504 = vmatpush3.bf16.msra.mxu1 %v2906_v5  ;;  %2647 = vmatprep.subr.bf16.mxu0 %v2907_v7  ;;  %v3880_v17 = vld [vmem:[#allocation2 + $0x50] sm:$0xff]  ;;  %v2934_v5 = vld [vmem:[#allocation9 + $0x1f8] sm:$0xff]  }
 0x24d   : > { %776 = vst [vmem:[#allocation2 + $0x71] sm:$0xff] %v746_v13  ;;  %v3882_v6 = vmax.f32 %v739_v14, 0.0  ;;  %2505 = vmatprep.subr.bf16.mxu1 %v2908_v12  ;;  %v3886_v19 = vpack.c.bf16 %v3880_v17, %v3878_v16  ;;  %v3888_v21 = vpack.c.bf16 %v746_v13, %v745_v57  ;;  %v862_v8 = vld [vmem:[#allocation2 + $0x52] sm:$0xff]  ;;  %v2939_v12 = vld [vmem:[#allocation10 + $0x18] sm:$0xff]  }
 0x24e   : > { %v863_v22 = vld [vmem:[#allocation2 + $0x62] sm:$0xff]  ;;  %v916_v38 = vpack.c.bf16 %v862_v8, %v3867_v63  ;;  %v2942_v14 = vld [vmem:[#allocation10 + $0x30] sm:$0xff]  }
 0x24f   : > { %777 = vst [vmem:[#allocation2 + $0x81] sm:$0xff] %v3882_v6  ;;  %2648 = vmatpush3.bf16.msra.mxu0 %v2907_v7  ;;  %1584 = vmatmul.mubr.bf16.gmra.mrb[8].mxu1 %v3886_v19  ;;  %v868_v23 = vpack.c.bf16 %v863_v22, %v862_v8  ;;  %v853_v24 = vpack.c.bf16 %v3882_v6, %v746_v13  ;;  %v784_v28 = vld [vmem:[#allocation2 + $0x60] sm:$0xff]  ;;  %v2941_v13 = vld [vmem:[#allocation10 + $0x28] sm:$0xff]  }
 0x250   : > { %2506 = vmatpush3.bf16.msra.mxu1 %v2909_v15  ;;  %2649 = vmatprep.subr.bf16.mxu0 %v2910_v18  ;;  %v836_v57 = vpack.c.bf16 %v784_v28, %v3880_v17  ;;  %v2929_v63 = vld [vmem:[#allocation9 + $0x1a0] sm:$0xff]   ;;  %v2935_v7 = vld [vmem:[#allocation9 + $0x1b8] sm:$0xff]   ;;  %v902_v10 = vpack.c.bf16 %v898_v9, %v3882_v6 }
 0x251   : > { %1713 = vmatprep.mubr.bf16.mxu0 %v868_v23  ;;  %2507 = vmatprep.subr.bf16.mxu1 %v2911_v20  ;;  %v2943_v15 = vld [vmem:[#allocation10 + $0x38] sm:$0xff]  }
 0x252   : > { %1714 = vmatmul.mubr.bf16.gmra.mrb[24].mxu0 %v852_v3  ;;  %1591 = vmatprep.mubr.bf16.mxu1 %v3888_v21  ;;  %v2932_v3 = vld [vmem:[#allocation9 + $0x1f0] sm:$0xff]  }
 0x253   : > { %2650 = vmatpush3.bf16.msra.mxu0 %v2910_v18 }
 0x254   : > { %2508 = vmatpush3.bf16.msra.mxu1 %v2912_v25  ;;  %2651 = vmatprep.subr.bf16.mxu0 %v2913_v26  ;;  %v3894_v29 = vld [vmem:[#allocation2 + $0x70] sm:$0xff] }
 0x255   : > { %2509 = vmatprep.subr.bf16.mxu1 %v2914_v27  ;;  %v3897_v32 = vpack.c.bf16 %v3894_v29, %v784_v28  ;;  %v864_v36 = vld [vmem:[#allocation2 + $0x72] sm:$0xff] }
 0x256   : > { %v865_v39 = vld [vmem:[#allocation2 + $0x82] sm:$0xff]  ;;  %v917_v51 = vpack.c.bf16 %v864_v36, %v863_v22 }
 0x257   : > { %2652 = vmatpush3.bf16.msra.mxu0 %v2913_v26  ;;  %1592 = vmatmul.mubr.bf16.gmra.mrb[12].mxu1 %v3897_v32  ;;  %v869_v41 = vpack.c.bf16 %v865_v39, %v864_v36  ;;  %v918_v55 = vpack.c.bf16 %v914_v37, %v865_v39  ;;  %v833_v62 = vld [vmem:[#allocation2 + $0x80] sm:$0xff] }
 0x258   : > { %2510 = vmatpush3.bf16.msra.mxu1 %v2915_v31  ;;  %1632 = vmatprep.mubr.bf16.mxu1 %v834_v34  ;;  %v837_v1 = vpack.c.bf16 %v833_v62, %v3894_v29  ;;  %v886_v11 = vpack.c.bf16 %v3369_v52, %v833_v62  ;;  %v2940_v52 = vld [vmem:[#allocation10 + $0x20] sm:$0xff]  }
 0x259   : > { %1721 = vmatprep.mubr.bf16.mxu0 %v869_v41  ;;  %2653 = vmatprep.subr.bf16.mxu0 %v2916_v33 }
 0x25a   : > { %1722 = vmatmul.mubr.bf16.gmra.mrb[28].mxu0 %v853_v24  ;;  %2511 = vmatprep.subr.bf16.mxu1 %v2917_v40 }
 0x25b   : > { %2654 = vmatpush3.bf16.msra.mxu0 %v2916_v33  ;;  %2657 = vmatprep.mubr.bf16.mxu0 %v915_v44 }
 0x25c   : > { %2512 = vmatpush3.bf16.msra.mxu1 %v2918_v42  ;;  %2655 = vmatprep.subr.bf16.mxu0 %v2919_v43 }
 0x25d   : > { %2577 = vmatprep.subr.bf16.mxu1 %v2920_v45 }
 0x25f   : > { %2656 = vmatpush3.bf16.msra.mxu0 %v2919_v43  ;;  %1633 = vmatmul.mubr.bf16.vlgmr.msra.gmra.mrb[16].mxu1 %v818_v47 }
 0x260   : > { %2578 = vmatpush3.bf16.msra.mxu1 %v2921_v46  ;;  %1640 = vmatprep.mubr.bf16.mxu1 %v835_v49 }
 0x261   : > { %2579 = vmatprep.subr.bf16.mxu1 %v2922_v48 }
 0x262   : > { %2658 = vmatmul.mubr.bf16.vlgmr.msra.gmra.mrb[32].mxu0 %v916_v38 }
 0x263   : > { %2661 = vmatprep.mubr.bf16.mxu0 %v917_v51 }
 0x264   : > { %2580 = vmatpush3.bf16.msra.mxu1 %v2923_v50 }
 0x265   : > { %2581 = vmatprep.subr.bf16.mxu1 %v2924_v53 }
 0x267   : > { %1641 = vmatmul.mubr.bf16.gmra.mrb[20].mxu1 %v915_v44 }
 0x268   : > { %2582 = vmatpush3.bf16.msra.mxu1 %v2925_v54  ;;  %1648 = vmatprep.mubr.bf16.mxu1 %v836_v57 }
 0x269   : > { %2583 = vmatprep.subr.bf16.mxu1 %v2926_v56 }
 0x26a   : > { %2662 = vmatmul.mubr.bf16.gmra.mrb[36].mxu0 %v918_v55 }
 0x26c   : > { %2584 = vmatpush3.bf16.msra.mxu1 %v2927_v59 }
 0x26d   : > { %2585 = vmatprep.subr.bf16.mxu1 %v2928_v61 }
 0x26f   : > { %1649 = vmatmul.mubr.bf16.gmra.mrb[24].mxu1 %v916_v38 }
 0x270   : > { %2586 = vmatpush3.bf16.msra.mxu1 %v2929_v63  ;;  %1656 = vmatprep.mubr.bf16.mxu1 %v837_v1 }
 0x271   : > { %2587 = vmatprep.subr.bf16.mxu1 %v2930_v0 }
 0x274   : > { %2588 = vmatpush3.bf16.msra.mxu1 %v2931_v2 }
 0x275   : > { %2589 = vmatprep.subr.bf16.mxu1 %v2932_v3 }
 0x277   : > { %1657 = vmatmul.mubr.bf16.gmra.mrb[28].mxu1 %v917_v51 }
 0x278   : > { %2590 = vmatpush3.bf16.msra.mxu1 %v2933_v4  ;;  %1762 = vmatprep.mubr.bf16.mxu1 %v3837_v35  ;;  %v2936_v35 = vld [vmem:[#allocation10] sm:$0xff]  }
 0x279   : > { %2591 = vmatprep.subr.bf16.mxu1 %v2934_v5  ;;  %2665 = vmatprep.subr.bf16.mxu0 %v2936_v35 }
 0x27a   : > { %2666 = vmatpush3.bf16.msra.mxu0 %v2936_v35 }
 0x27c   : > { %2592 = vmatpush3.bf16.msra.mxu1 %v2935_v7 }
 0x27d   : > { %2689 = vmatprep.subr.bf16.mxu1 %v2936_v35 }
 0x27f   : > { %1763 = vmatmul.mubr.bf16.vlgmr.msra.gmra.mrb[32].mxu1 %v3860_v58  ;;  %v2937_v58 = vld [vmem:[#allocation10 + $0x8] sm:$0xff]  }
 0x280   : > { %1770 = vmatprep.mubr.bf16.mxu1 %v3863_v60  ;;  %2697 = vmatpush3.bf16.msra.mxu1 %v2936_v35  ;;  %v2938_v60 = vld [vmem:[#allocation10 + $0x10] sm:$0xff]  }
 0x281   : > { %2667 = vmatprep.subr.bf16.mxu0 %v2937_v58  ;;  %2690 = vmatprep.subr.bf16.mxu1 %v2937_v58 }
 0x282   : > { %2668 = vmatpush3.bf16.msra.mxu0 %v2937_v58 }
 0x283   : > { %2669 = vmatprep.subr.bf16.mxu0 %v2938_v60 }
 0x284   : > { %2698 = vmatpush3.bf16.msra.mxu1 %v2937_v58 }
 0x285   : > { %2691 = vmatprep.subr.bf16.mxu1 %v2938_v60 }
 0x286   : > { %2670 = vmatpush3.bf16.msra.mxu0 %v2938_v60 }
 0x287   : > { %1771 = vmatmul.mubr.bf16.gmra.mrb[36].mxu1 %v3886_v19  ;;  %2671 = vmatprep.subr.bf16.mxu0 %v2939_v12 }
 0x288   : > { %1778 = vmatprep.mubr.bf16.mxu1 %v3888_v21  ;;  %2699 = vmatpush3.bf16.msra.mxu1 %v2938_v60 }
 0x289   : > { %2692 = vmatprep.subr.bf16.mxu1 %v2939_v12 }
 0x28a   : > { %2672 = vmatpush3.bf16.msra.mxu0 %v2939_v12 }
 0x28b   : > { %2673 = vmatprep.subr.bf16.mxu0 %v2940_v52 }
 0x28c   : > { %2700 = vmatpush3.bf16.msra.mxu1 %v2939_v12 }
 0x28d   : > { %2693 = vmatprep.subr.bf16.mxu1 %v2940_v52 }
 0x28e   : > { %2674 = vmatpush3.bf16.msra.mxu0 %v2940_v52 }
 0x28f   : > { %1779 = vmatmul.mubr.bf16.gmra.mrb[40].mxu1 %v3897_v32  ;;  %2675 = vmatprep.subr.bf16.mxu0 %v2941_v13 }
 0x290   : > { %1786 = vmatprep.mubr.bf16.mxu1 %v902_v10  ;;  %2701 = vmatpush3.bf16.msra.mxu1 %v2940_v52 }
 0x291   : > { %2694 = vmatprep.subr.bf16.mxu1 %v2941_v13 }
 0x292   : > { %2676 = vmatpush3.bf16.msra.mxu0 %v2941_v13 }
 0x293   : > { %2677 = vmatprep.subr.bf16.mxu0 %v2942_v14 }
 0x294   : > { %2702 = vmatpush3.bf16.msra.mxu1 %v2941_v13 }
 0x295   : > { %2695 = vmatprep.subr.bf16.mxu1 %v2942_v14 }
 0x296   : > { %2678 = vmatpush3.bf16.msra.mxu0 %v2942_v14 }
 0x297   : > { %1787 = vmatmul.mubr.bf16.gmra.mrb[44].mxu1 %v886_v11  ;;  %2679 = vmatprep.subr.bf16.mxu0 %v2943_v15 }
 0x298   : > { %2703 = vmatpush3.bf16.msra.mxu1 %v2942_v14 }
 0x299   : > { %2696 = vmatprep.subr.bf16.mxu1 %v2943_v15 }
 0x29a   : > { %2680 = vmatpush3.bf16.msra.mxu0 %v2943_v15 }
 0x29c   : > { %2704 = vmatpush3.bf16.msra.mxu1 %v2943_v15 }
 0x312   : > { %v2473_v16 = vpop.f32.mrb[0].mxu1 }
 0x313   : > { %v2474_v17 = vpop.f32.mrb[1].mxu1 }
 0x314   : > { %v2475_v18 = vadd.f32 %v2474_v17, %v2473_v16  ;;  %v2476_v6 = vpop.f32.mrb[2].mxu1 }
 0x315   : > { %v2553_v19 = vpop.f32.mrb[16].mxu0  ;;  %v2477_v20 = vpop.f32.mrb[3].mxu1 }
 0x316   : > { %v2478_v21 = vadd.f32 %v2477_v20, %v2476_v6  ;;  %v2554_v8 = vpop.f32.mrb[17].mxu0 }
 0x317   : > { %v2555_v22 = vadd.f32 %v2554_v8, %v2553_v19  ;;  %v2556_v23 = vpop.f32.mrb[18].mxu0 }
 0x318   : > { %v2557_v24 = vpop.f32.mrb[19].mxu0 }
 0x319   : > { %v2558_v25 = vadd.f32 %v2557_v24, %v2556_v23 }
 0x31a   : > { %v2479_v26 = vpop.f32.mrb[4].mxu1 }
 0x31b   : > { %v2480_v27 = vpop.f32.mrb[5].mxu1 }
 0x31c   : > { %v2481_v28 = vadd.f32 %v2480_v27, %v2479_v26  ;;  %v2482_v29 = vpop.f32.mrb[6].mxu1 }
 0x31d   : > { %v2559_v31 = vpop.f32.mrb[20].mxu0  ;;  %v2483_v32 = vpop.f32.mrb[7].mxu1 }
 0x31e   : > { %v2484_v33 = vadd.f32 %v2483_v32, %v2482_v29  ;;  %v2560_v34 = vpop.f32.mrb[21].mxu0 }
 0x31f   : > { %v2561_v36 = vadd.f32 %v2560_v34, %v2559_v31  ;;  %v2562_v39 = vpop.f32.mrb[22].mxu0 }
 0x320   : > { %v2563_v40 = vpop.f32.mrb[23].mxu0 }
 0x321   : > { %v2564_v41 = vadd.f32 %v2563_v40, %v2562_v39 }
 0x322   : > { %v2485_v42 = vpop.f32.mrb[8].mxu1 }
 0x323   : > { %v2486_v43 = vpop.f32.mrb[9].mxu1 }
 0x324   : > { %v2487_v44 = vadd.f32 %v2486_v43, %v2485_v42  ;;  %v2488_v45 = vpop.f32.mrb[10].mxu1 }
 0x325   : > { %v2565_v30 = vpop.f32.mrb[24].mxu0  ;;  %v2489_v46 = vpop.f32.mrb[11].mxu1 }
 0x326   : > { %v2490_v47 = vadd.f32 %v2489_v46, %v2488_v45  ;;  %v2566_v48 = vpop.f32.mrb[25].mxu0 }
 0x327   : > { %v2567_v49 = vadd.f32 %v2566_v48, %v2565_v30  ;;  %v2568_v38 = vpop.f32.mrb[26].mxu0 }
 0x328   : > { %v2569_v50 = vpop.f32.mrb[27].mxu0 }
 0x329   : > { %v2570_v51 = vadd.f32 %v2569_v50, %v2568_v38 }
 0x32a   : > { %v2491_v53 = vpop.f32.mrb[12].mxu1 }
 0x32b   : > { %v2492_v54 = vpop.f32.mrb[13].mxu1 }
 0x32c   : > { %v2493_v37 = vadd.f32 %v2492_v54, %v2491_v53  ;;  %v2494_v56 = vpop.f32.mrb[14].mxu1 }
 0x32d   : > { %v2571_v57 = vpop.f32.mrb[28].mxu0  ;;  %v2495_v55 = vpop.f32.mrb[15].mxu1 }
 0x32e   : > { %v2496_v59 = vadd.f32 %v2495_v55, %v2494_v56  ;;  %v2572_v61 = vpop.f32.mrb[29].mxu0 }
 0x32f   : > { %v2573_v62 = vadd.f32 %v2572_v61, %v2571_v57  ;;  %v2574_v63 = vpop.f32.mrb[30].mxu0 }
 0x330   : > { %v2575_v0 = vpop.f32.mrb[31].mxu0 }
 0x331   : > { %v2576_v1 = vadd.f32 %v2575_v0, %v2574_v63 }
 0x332   : > { %v2513_v2 = vpop.f32.mrb[16].mxu1 }
 0x333   : > { %v2514_v3 = vpop.f32.mrb[17].mxu1 }
 0x334   : > { %v2515_v4 = vadd.f32 %v2514_v3, %v2513_v2  ;;  %v2516_v5 = vpop.f32.mrb[18].mxu1 }
 0x335   : > { %v3918_v7 = vpop.f32.mrb[32].mxu0  ;;  %v2517_v9 = vpop.f32.mrb[19].mxu1 }
 0x336   : > { %v1635_v10 = vadd.f32 %v2515_v4, %v2475_v18  ;;  %v2518_v11 = vadd.f32 %v2517_v9, %v2516_v5  ;;  %v1829_v35 = vpop.f32.mrb[33].mxu0 }
 0x337   : > { %v3920_v58 = vpop.f32.mrb[34].mxu0 }
 0x338   : > { %v1638_v60 = vadd.f32 %v2518_v11, %v2478_v21  ;;  %v1832_v12 = vpop.f32.mrb[35].mxu0  ;;  %v1700_v52 = vadd.f32 %v2555_v22, %v1635_v10 }
 0x33a   : > { %v2519_v13 = vpop.f32.mrb[20].mxu1  ;;  %v1703_v14 = vadd.f32 %v2558_v25, %v1638_v60 }
 0x33b   : > { %v2520_v15 = vpop.f32.mrb[21].mxu1 }
 0x33c   : > { %v2521_v16 = vadd.f32 %v2520_v15, %v2519_v13  ;;  %v2522_v17 = vpop.f32.mrb[22].mxu1 }
 0x33d   : > { %v3922_v6 = vpop.f32.mrb[36].mxu0  ;;  %v2523_v19 = vpop.f32.mrb[23].mxu1 }
 0x33e   : > { %v1643_v20 = vadd.f32 %v2521_v16, %v2481_v28  ;;  %v2524_v8 = vadd.f32 %v2523_v19, %v2522_v17  ;;  %v3924_v23 = vpop.f32.mrb[37].mxu0 }
 0x33f   : > { %v3926_v18 = vpop.f32.mrb[38].mxu0 }
 0x340   : > { %v1646_v24 = vadd.f32 %v2524_v8, %v2484_v33  ;;  %v3928_v26 = vpop.f32.mrb[39].mxu0  ;;  %v1708_v21 = vadd.f32 %v2561_v36, %v1643_v20 }
 0x342   : > { %v2525_v27 = vpop.f32.mrb[24].mxu1  ;;  %v1711_v22 = vadd.f32 %v2564_v41, %v1646_v24 }
 0x343   : > { %v2526_v29 = vpop.f32.mrb[25].mxu1 }
 0x344   : > { %v2527_v25 = vadd.f32 %v2526_v29, %v2525_v27  ;;  %v2528_v31 = vpop.f32.mrb[26].mxu1 }
 0x345   : > { %v2529_v32 = vpop.f32.mrb[27].mxu1 }
 0x346   : > { %v1651_v34 = vadd.f32 %v2527_v25, %v2487_v44  ;;  %v2530_v39 = vadd.f32 %v2529_v32, %v2528_v31 }
 0x348   : > { %v1654_v40 = vadd.f32 %v2530_v39, %v2490_v47  ;;  %v1716_v42 = vadd.f32 %v2567_v49, %v1651_v34  ;;  %v2434_v47 = vld [vmem:[#allocation15] ss:$0 sm:$0xff] }
 0x34a   : > { %v2531_v28 = vpop.f32.mrb[28].mxu1  ;;  %v1719_v43 = vadd.f32 %v2570_v51, %v1654_v40  ;;  %v2435_v51 = vld [vmem:[#allocation16] ss:$0 sm:$0xff] }
 0x34b   : > { %v2532_v45 = vpop.f32.mrb[29].mxu1 }
 0x34c   : > { %v2533_v30 = vadd.f32 %v2532_v45, %v2531_v28  ;;  %v2534_v46 = vpop.f32.mrb[30].mxu1 }
 0x34d   : > { %v2535_v48 = vpop.f32.mrb[31].mxu1 }
 0x34e   : > { %v1659_v33 = vadd.f32 %v2533_v30, %v2493_v37  ;;  %v2536_v38 = vadd.f32 %v2535_v48, %v2534_v46 }
 0x350   : > { %v1662_v50 = vadd.f32 %v2536_v38, %v2496_v59  ;;  %v1724_v36 = vadd.f32 %v2573_v62, %v1659_v33 }
 0x352   : > { %v2593_v53 = vpop.f32.mrb[32].mxu1  ;;  %v1727_v41 = vadd.f32 %v2576_v1, %v1662_v50 }
 0x353   : > { %v2594_v54 = vpop.f32.mrb[33].mxu1 }
 0x354   : > { %v2595_v56 = vadd.f32 %v2594_v54, %v2593_v53  ;;  %v2596_v57 = vpop.f32.mrb[34].mxu1 }
 0x355   : > { %v2597_v55 = vpop.f32.mrb[35].mxu1 }
 0x356   : > { %v1765_v44 = vadd.f32 %v2595_v56, %v1700_v52  ;;  %v2598_v61 = vadd.f32 %v2597_v55, %v2596_v57 }
 0x358   : > { %v1830_v49 = vadd.f32 %v1829_v35, %v1765_v44  ;;  %v1768_v63 = vadd.f32 %v2598_v61, %v1703_v14 }
 0x35a   : > { %v1867_v0 = vmul.f32 %v2434_v47, %v1830_v49  ;;  %v1833_v2 = vadd.f32 %v1832_v12, %v1768_v63  ;;  %v2599_v3 = vpop.f32.mrb[36].mxu1 }
 0x35b   : > { %v2600_v4 = vpop.f32.mrb[37].mxu1 }
 0x35c   : > { %v1868_v37 = vmul.f32 %v2434_v47, %v1833_v2  ;;  %v2601_v5 = vadd.f32 %v2600_v4, %v2599_v3  ;;  %v2602_v59 = vpop.f32.mrb[38].mxu1  ;;  %v1882_v62 = vadd.f32 %v2435_v51, %v1867_v0  ;;  %v2445_v2 = vld [vmem:[#allocation19] ss:$0 sm:$0xff] }
 0x35d   : > { %v2603_v9 = vpop.f32.mrb[39].mxu1 }
 0x35e   : > { %v1773_v1 = vadd.f32 %v2601_v5, %v1708_v21  ;;  %v2604_v10 = vadd.f32 %v2603_v9, %v2602_v59  ;;  %v1883_v11 = vadd.f32 %v2435_v51, %v1868_v37  ;;  %v1890_v13 = vmax.f32 %v1882_v62, 0.0  ;;  %v2944_v62 = vld [vmem:[%s3751_s11 + $0x20] sm:$0xff] }
 0x360   : > { %v1838_v60 = vadd.f32 %v3918_v7, %v1773_v1  ;;  %v1776_v52 = vadd.f32 %v2604_v10, %v1711_v22  ;;  %v1891_v15 = vmax.f32 %v1883_v11, 0.0  ;;  %v2945_v10 = vld [vmem:[%s3751_s11] sm:$0xff] }
 0x362   : > { %v1869_v35 = vmul.f32 %v2434_v47, %v1838_v60  ;;  %v1841_v14 = vadd.f32 %v3920_v58, %v1776_v52  ;;  %v2605_v16 = vpop.f32.mrb[40].mxu1  ;;  %v1898_v12 = vpack.c.bf16 %v1891_v15, %v1890_v13  ;;  %v2946_v13 = vld [vmem:[%s3751_s11 + $0x30] sm:$0xff] }
 0x363   : > { %v2606_v17 = vpop.f32.mrb[41].mxu1 }
 0x364   : > { %v1884_v19 = vadd.f32 %v2435_v51, %v1869_v35  ;;  %v1870_v20 = vmul.f32 %v2434_v47, %v1841_v14  ;;  %v2607_v8 = vadd.f32 %v2606_v17, %v2605_v16  ;;  %v2608_v24 = vpop.f32.mrb[42].mxu1  ;;  %2681 = vmatprep.mubr.bf16.mxu0 %v1898_v12  ;;  %v2947_v14 = vld [vmem:[%s3751_s11 + $0x10] sm:$0xff] }
 0x365   : > { %v2609_v27 = vpop.f32.mrb[43].mxu1 }
 0x366   : > { %v1885_v21 = vadd.f32 %v2435_v51, %v1870_v20  ;;  %v1781_v29 = vadd.f32 %v2607_v8, %v1716_v42  ;;  %v2610_v25 = vadd.f32 %v2609_v27, %v2608_v24  ;;  %v1892_v31 = vmax.f32 %v1884_v19, 0.0 }
 0x368   : > { %v1893_v7 = vmax.f32 %v1885_v21, 0.0  ;;  %v1846_v22 = vadd.f32 %v3924_v23, %v1781_v29  ;;  %v1784_v32 = vadd.f32 %v2610_v25, %v1719_v43 }
 0x36a   : > { %v1899_v34 = vpack.c.bf16 %v1893_v7, %v1892_v31  ;;  %v1871_v39 = vmul.f32 %v2434_v47, %v1846_v22  ;;  %v1849_v58 = vadd.f32 %v3928_v26, %v1784_v32  ;;  %v2611_v40 = vpop.f32.mrb[44].mxu1  ;;  %v2948_v22 = vld [vmem:[%s3751_s11 + $0x60] sm:$0xff] }
 0x36b   : > { %v2612_v28 = vpop.f32.mrb[45].mxu1 }
 0x36c   : > { %v1872_v45 = vmul.f32 %v2434_v47, %v1849_v58  ;;  %v2613_v30 = vadd.f32 %v2612_v28, %v2611_v40  ;;  %v2614_v46 = vpop.f32.mrb[46].mxu1  ;;  %2682 = vmatmul.mubr.bf16.vlgmr.msra.gmra.mrb[40].mxu0 %v1899_v34  ;;  %v1886_v48 = vadd.f32 %v2435_v51, %v1871_v39  ;;  %v2949_v39 = vld [vmem:[%s3751_s11 + $0x40] sm:$0xff] }
 0x36d   : > { %v2615_v33 = vpop.f32.mrb[47].mxu1 }
 0x36e   : > { %v1789_v38 = vadd.f32 %v2613_v30, %v1724_v36  ;;  %v2616_v42 = vadd.f32 %v2615_v33, %v2614_v46  ;;  %v1887_v50 = vadd.f32 %v2435_v51, %v1872_v45  ;;  %v1894_v43 = vmax.f32 %v1886_v48, 0.0  ;;  %v2444_v36 = vld [vmem:[#allocation18] ss:$0 sm:$0xff]  ;;  %v2950_v45 = vld [vmem:[%s3751_s11 + $0x70] sm:$0xff] }
 0x36f   : > { %v2951_v48 = vld [vmem:[%s3751_s11 + $0x50] sm:$0xff] }
 0x370   : > { %v1854_v53 = vadd.f32 %v3922_v6, %v1789_v38  ;;  %v1792_v23 = vadd.f32 %v2616_v42, %v1727_v41  ;;  %v1895_v54 = vmax.f32 %v1887_v50, 0.0 }
 0x372   : > { %v1873_v56 = vmul.f32 %v2434_v47, %v1854_v53  ;;  %v1857_v26 = vadd.f32 %v3926_v18, %v1792_v23  ;;  %v1900_v57 = vpack.c.bf16 %v1895_v54, %v1894_v43 }
 0x374   : > { %v1888_v55 = vadd.f32 %v2435_v51, %v1873_v56  ;;  %v1874_v44 = vmul.f32 %v2434_v47, %v1857_v26  ;;  %2685 = vmatprep.mubr.bf16.mxu1 %v1900_v57 }
 0x376   : > { %v1889_v61 = vadd.f32 %v2435_v51, %v1874_v44  ;;  %v1896_v49 = vmax.f32 %v1888_v55, 0.0 }
 0x378   : > { %v1897_v63 = vmax.f32 %v1889_v61, 0.0 }
 0x37a   : > { %v1901_v0 = vpack.c.bf16 %v1897_v63, %v1896_v49 }
 0x37c   : > { %2686 = vmatmul.mubr.bf16.vlgmr.msra.gmra.mrb[48].mxu1 %v1901_v0 }
 0x43f   : > { %v2683_v6 = vpop.f32.mrb[40].mxu0 }
 0x440   : > { %v2040_v41 = vmul.f32 %v2683_v6, %v2444_v36  ;;  %v2000_v3 = vpop.f32.mrb[41].mxu0 }
 0x441   : > { %v2038_v4 = vmul.f32 %v2444_v36, %v2000_v3  ;;  %v2684_v37 = vpop.f32.mrb[42].mxu0 }
 0x442   : > { %v2055_v18 = vadd.f32 %v2445_v2, %v2040_v41  ;;  %v2041_v5 = vmul.f32 %v2684_v37, %v2444_v36  ;;  %v2003_v47 = vpop.f32.mrb[43].mxu0 }
 0x443   : > { %v2053_v59 = vadd.f32 %v2445_v2, %v2038_v4  ;;  %v2039_v51 = vmul.f32 %v2444_v36, %v2003_v47 }
 0x444   : > { %2063 = vst [vmem:[%s3937_s10 + $0x10] sm:$0xff] %v2055_v18  ;;  %v2071_v9 = vadd.f32 %v2944_v62, %v2055_v18  ;;  %v2056_v1 = vadd.f32 %v2445_v2, %v2041_v5 }
 0x445   : > { %2061 = vst [vmem:[%s3937_s10] sm:$0xff] %v2053_v59  ;;  %v2069_v11 = vadd.f32 %v2945_v10, %v2053_v59  ;;  %v2054_v60 = vadd.f32 %v2445_v2, %v2039_v51 }
 0x446   : > { %v2079_v52 = vmax.f32 %v2071_v9, 0.0  ;;  %2064 = vst [vmem:[%s3937_s10 + $0x18] sm:$0xff] %v2056_v1  ;;  %v2072_v15 = vadd.f32 %v2946_v13, %v2056_v1 }
 0x447   : > { %v2077_v35 = vmax.f32 %v2069_v11, 0.0  ;;  %2062 = vst [vmem:[%s3937_s10 + $0x8] sm:$0xff] %v2054_v60  ;;  %v2070_v16 = vadd.f32 %v2947_v14, %v2054_v60 }
 0x448   : > { %2087 = vst [vmem:[%s3947_s29 + $0x10] sm:$0xff] %v2079_v52  ;;  %v2080_v12 = vmax.f32 %v2072_v15, 0.0 }
 0x449   : > { %2085 = vst [vmem:[%s3947_s29] sm:$0xff] %v2077_v35  ;;  %v2078_v17 = vmax.f32 %v2070_v16, 0.0 }
 0x44a   : > { %2088 = vst [vmem:[%s3947_s29 + $0x18] sm:$0xff] %v2080_v12 }
 0x44b   : > { %2086 = vst [vmem:[%s3947_s29 + $0x8] sm:$0xff] %v2078_v17 }
 0x44f   : > { %v2687_v19 = vpop.f32.mrb[48].mxu1 }
 0x450   : > { %v2044_v20 = vmul.f32 %v2687_v19, %v2444_v36  ;;  %v2016_v8 = vpop.f32.mrb[49].mxu1 }
 0x451   : > { %v2042_v24 = vmul.f32 %v2444_v36, %v2016_v8  ;;  %v2688_v27 = vpop.f32.mrb[50].mxu1 }
 0x452   : > { %v2059_v21 = vadd.f32 %v2445_v2, %v2044_v20  ;;  %v2045_v29 = vmul.f32 %v2688_v27, %v2444_v36  ;;  %v2019_v25 = vpop.f32.mrb[51].mxu1 }
 0x453   : > { %v2057_v31 = vadd.f32 %v2445_v2, %v2042_v24  ;;  %v2043_v7 = vmul.f32 %v2444_v36, %v2019_v25 }
 0x454   : > { %2067 = vst [vmem:[%s3937_s10 + $0x30] sm:$0xff] %v2059_v21  ;;  %v2075_v32 = vadd.f32 %v2948_v22, %v2059_v21  ;;  %v2060_v34 = vadd.f32 %v2445_v2, %v2045_v29 }
 0x455   : > { %2065 = vst [vmem:[%s3937_s10 + $0x20] sm:$0xff] %v2057_v31  ;;  %v2073_v58 = vadd.f32 %v2949_v39, %v2057_v31  ;;  %v2058_v40 = vadd.f32 %v2445_v2, %v2043_v7 }
 0x456   : > { %v2083_v28 = vmax.f32 %v2075_v32, 0.0  ;;  %2068 = vst [vmem:[%s3937_s10 + $0x38] sm:$0xff] %v2060_v34  ;;  %v2076_v30 = vadd.f32 %v2950_v45, %v2060_v34 }
 0x457   : > { %v2081_v46 = vmax.f32 %v2073_v58, 0.0  ;;  %2066 = vst [vmem:[%s3937_s10 + $0x28] sm:$0xff] %v2058_v40  ;;  %v2074_v33 = vadd.f32 %v2951_v48, %v2058_v40 }
 0x458   : > { %2091 = vst [vmem:[%s3947_s29 + $0x30] sm:$0xff] %v2083_v28  ;;  %v2084_v38 = vmax.f32 %v2076_v30, 0.0 }
 0x459   : > { %3247 = shalt.err (!%p3244_p0)
}
 0x45a   : > { %s3248_s11 = scalar_lea.hbm %s3966_s26, 1024  ;;  %s3252_s21 = scalar_lea.hbm %s4112_s28, 2048 }
 0x45b   : > { %p3249_p5 = scmp.ne.s32.totalorder %s3966_s26, %s3248_s11  ;;  %p3253_p4 = scmp.lt.u32.totalorder %s3966_s26, %s4112_s28 }
 0x45c   : > { %p3254_p12 = scmp.lt.u32.totalorder %s3252_s21, %s3248_s11  ;;  %p3256_p1 = scmp.lt.u32.totalorder %s3248_s11, %s3966_s26 }
 0x45d   : > { %p3250_p9 = pnand %p3249_p5, %p4113_p3 }
 0x45e   : > { %p3255_p13 = por %p3254_p12, %p3253_p4 }
 0x45f   : > { %p3251_p7 = pneg %p3250_p9 }
 0x460   : > { %p3257_p2 = por %p3256_p1, %p3255_p13 }
 0x462   : > { %p3258_p8 = pnand %p3257_p2, %p3251_p7 }
 0x464   : > { %3261 = shalt.err (!%p3258_p8)
}
 0x465   : > { %s3371_s16 = smov 128   ;;  %s3372_s24 = smov 8   ;;  %2089 = vst [vmem:[%s3947_s29 + $0x20] sm:$0xff] %v2081_v46  ;;  %v2082_v42 = vmax.f32 %v2074_v33, 0.0  ;;  %2092 = vst [vmem:[%s3947_s29 + $0x38] sm:$0xff] %v2084_v38 }
 0x466   : > { %s4114_s13 = scalar_lea.sflag [#allocation23], %s3747_s22  ;;  %s4115_s15 = sshll.u32 %s3455_s23, 10 }
 0x467   : > { %2744 = dma.vmem_to_hbm [thread:$0]  (%p4113_p3), %s3955_s25, 1024, %s3966_s26, %s4114_s13, %s3371_s16, %s3371_s16, %s3372_s24  }
 0x468   : > { %s4116_s21 = sld [smem:[#allocation37_spill]]  ;;  %s4117_s0 = sshll.u32 %s3947_s29, 4  ;;  %2090 = vst [vmem:[%s3947_s29 + $0x28] sm:$0xff] %v2082_v42  ;;  %s4011_s0 = int_to_ptr.vmem [resolvable:$true] %s4117_s0 }
 0x469   : > { %s2094_s2 = scalar_lea.sflag [#allocation6], %s3747_s22  ;;  %s3262_s3 = scalar_lea.vmem %s4011_s0, 1024 }
 0x46a   : > { %p3263_p6 = scmp.ne.s32.totalorder %s4011_s0, %s3262_s3  ;;  %s3373_s23 = smov [#allocation21]  }
 0x46b   : > { %s3266_s25 = sshll.u32 %s3373_s23, 4  ;;  %s3267_s25 = int_to_ptr.vmem [resolvable:$false] %s3266_s25 }
 0x46c   : > { %p3264_p10 = pnand %p3263_p6, %p4113_p3  ;;  %s3268_s26 = scalar_lea.vmem %s3267_s25, 2048 }
 0x46d   : > { %p3269_p0 = scmp.lt.s32.totalorder %s4011_s0, %s3267_s25  ;;  %p3270_p5 = scmp.lt.s32.totalorder %s3268_s26, %s3262_s3 }
 0x46e   : > { %s4007_s30 = scalar_lea.hbm %s4116_s21, %s4115_s15  ;;  %p3265_p11 = pneg %p3264_p10 }
 0x46f   : > { %p3271_p9 = por %p3270_p5, %p3269_p0 }
 0x471   : > { %p3272_p7 = pnand %p3271_p9, %p3265_p11 }
 0x473   : > { %3275 = shalt.err (!%p3272_p7)
}
 0x474   : > { %s3276_s29 = scalar_lea.hbm %s4007_s30, 1024  ;;  %s3280_s11 = scalar_lea.hbm %s4116_s21, 2048 }
 0x475   : > { %p3277_p4 = scmp.ne.s32.totalorder %s4007_s30, %s3276_s29  ;;  %p3281_p1 = scmp.lt.u32.totalorder %s4007_s30, %s4116_s21 }
 0x476   : > { %p3282_p2 = scmp.lt.u32.totalorder %s3280_s11, %s3276_s29  ;;  %p3284_p6 = scmp.lt.u32.totalorder %s3276_s29, %s4007_s30 }
 0x477   : > { %p3278_p12 = pnand %p3277_p4, %p4113_p3 }
 0x478   : > { %p3283_p8 = por %p3282_p2, %p3281_p1 }
 0x479   : > { %p3279_p13 = pneg %p3278_p12 }
 0x47a   : > { %p3285_p10 = por %p3284_p6, %p3283_p8 }
 0x47c   : > { %p3286_p11 = pnand %p3285_p10, %p3279_p13 }
 0x47e   : > { %3289 = shalt.err (!%p3286_p11)
}
 0x47f   : > { %2743 = dma.vmem_to_hbm [thread:$0]  (%p4113_p3), %s4011_s0, 1024, %s4007_s30, %s2094_s2, %s3371_s16, %s3371_s16, %s3372_s24  }
 0x480 PF: > { %s2143_s3 = sand.u32 1, %s3340_s17   ;;  %p4118_p0 = scmp.ne.s32.totalorder %s4097_s14, 0 }
 0x481   : > { %p4119_p5 = scmp.ge.s32.totalorder %s3352_s20, 2  ;;  %s2144_s25 = scalar_lea.sflag [#allocation6], %s2143_s3 }
 0x483   : > { %p2780_p9 = pnand %p4119_p5, %p4118_p0 }
 0x485   : > { %3331 = dma.done.wait (!%p2780_p9), %s2144_s25, 1024  }
 0x486   : > { %3333 = vsyncadd (!%p2780_p9), %s2144_s25, 4294966272  ;;  %s2153_s1 = scalar_lea.sflag [#allocation23], %s2143_s3 }
 0x487   : > { %3335 = dma.done.wait (!%p2780_p9), %s2153_s1, 1024  }
 0x488   : > { %3337 = vsyncadd (!%p2780_p9), %s2153_s1, 4294966272  ;;  %p33_p3 = scmp.ge.s32.totalorder %s3674_s27, 4   ;;  %s4120_s17 = smov %s3344_s18 }
 0x489   : > { %s4121_s18 = smov %s3348_s19  ;;  %s4122_s19 = smov %s3686_s12 }
 0x48a   : > { %s4123_s20 = smov %s3674_s27  ;;  %35 = sbr.rel (!%p33_p3) target bundleno = 19 (0x13), region = 161 }
 0x491   :  { %2158 = vsyncpa [#allocation5], 1 }
 0x492   :  { %2160 = vsyncpa [#allocation5 + $0x1], 1 }
 0x493   :  { %2161 = vsyncpa [#allocation8], 1 }
 0x494   :  { %2162 = vsyncpa [#allocation11], 1 }
 0x495   :  { %2163 = vsyncpa [#allocation14], 1 }
 0x496   :  { %2164 = vsyncpa [#allocation17], 1 }
 0x497   :  { %2165 = vsyncpa [#allocation20], 1 }
 0x498   :  { %2166 = vsyncpa [#allocation6], 1 }
 0x499   :  { %2168 = vsyncpa [#allocation6 + $0x1], 1 }
 0x49a   :  { %2169 = vsyncpa [#allocation23], 1 }
 0x49b   :  { %2171 = vsyncpa [#allocation23 + $0x1], 1 }

</bundles_post_ra>
